<compile_context>
chip_gen: v7x
topology: tpu7x:2x2x1
jax: 0.10.0
libtpu: 0.0.40
codegen_flags: <defaults>
</compile_context>

<pallas_src>
import functools

import jax
import jax.numpy as jnp
from jax.experimental import pallas as pl
from jax.experimental.pallas import tpu as pltpu

LANE = 128


def _dwpw_conv_kernel(x_ref, halo_ref, dw_ref, pw_ref, y_ref, stats_ref, *, W):
    """Pass 1: depthwise 3x3 + pointwise 1x1 conv on one (N, H-tile) block.

    x_ref     : (1, TW, Cp)      flattened (row-major H,W) spatial rows of this tile
    halo_ref  : (1, 1, 2*W, Cp)  image row just above and just below the tile (zeros at edges)
    dw_ref    : (9, Cp)          depthwise weights, row ki*3+kj
    pw_ref    : (Cp, Cp)         pointwise weights (Cin, Cout), f32 or bf16
    y_ref     : (1, TW, Cp)      conv output (f32, or bf16 on the bf16 path)
    stats_ref : (1, 2, Cp)       per-tile per-channel [sum, sum-of-squares] (f32)
    """
    TW = x_ref.shape[1]              # TILE_H * W rows in this tile
    L = TW + 2 * W                   # rows including one halo image-row on each side

    x = x_ref[0].astype(jnp.float32)             # (TW, Cp)
    halo = halo_ref[0, 0].astype(jnp.float32)    # (2W, Cp): [row above | row below]
    dw = dw_ref[...].astype(jnp.float32)         # (9, Cp)

    # Full slab: [halo row above][tile rows][halo row below], still flattened (row, W).
    xf = jnp.concatenate([halo[:W], x, halo[W:]], axis=0)        # (L, Cp)

    # Within-image-row column index as a narrow (L, 1) iota; broadcasts across lanes
    # inside the where() — avoids a full (L, Cp) int32 iota / modulo / compare.
    col = jax.lax.broadcasted_iota(jnp.int32, (L, 1), 0) % W
    not_first = col > 0
    not_last = col < (W - 1)

    # Horizontal +/-1 shifts via XLU rolls; wrapped elements land exactly on the masked
    # (image-edge) columns, so a single where() restores zero padding.
    x_l = jnp.where(not_first, pltpu.roll(xf, 1, axis=0), 0.0)        # input col w-1
    x_r = jnp.where(not_last, pltpu.roll(xf, L - 1, axis=0), 0.0)     # input col w+1

    # Vertical tap ki selects rows [ki*W : ki*W + TW] of the (shifted) slab.
    acc = (dw[0] * x_l[0:TW]             + dw[1] * xf[0:TW]             + dw[2] * x_r[0:TW]
         + dw[3] * x_l[W:W + TW]         + dw[4] * xf[W:W + TW]         + dw[5] * x_r[W:W + TW]
         + dw[6] * x_l[2 * W:2 * W + TW] + dw[7] * xf[2 * W:2 * W + TW] + dw[8] * x_r[2 * W:2 * W + TW])

    # Pointwise 1x1 conv == channel matmul on the MXU.  When pw arrives in bf16 the
    # lhs is cast too, giving the native bf16 MXU path; accumulation stays f32.
    y = jnp.dot(acc.astype(pw_ref.dtype), pw_ref[...],
                preferred_element_type=jnp.float32)                   # (TW, Cp) f32

    # BN partials are taken from the f32 accumulator before any down-cast.
    stats_ref[0] = jnp.concatenate(
        [jnp.sum(y, axis=0, keepdims=True),
         jnp.sum(y * y, axis=0, keepdims=True)], axis=0)              # (2, Cp)
    y_ref[0] = y.astype(y_ref.dtype)


def _bn_act_kernel(y_ref, scale_ref, shift_ref, o_ref, *, activation):
    """Pass 2: y * scale + shift (folded BatchNorm) and optional SiLU."""
    z = y_ref[...].astype(jnp.float32) * scale_ref[...] + shift_ref[...]   # (R2, Cp)
    if activation:
        z = z * jax.nn.sigmoid(z)
    o_ref[...] = z.astype(o_ref.dtype)


def _vmem_limit_bytes():
    """Generation-aware scoped-VMEM limit (<= 3/4 of physical VMEM, capped at 96 MiB)."""
    try:
        cap = int(pltpu.get_tpu_info().vmem_capacity_bytes)
    except Exception:
        cap = 64 * 1024 * 1024          # assume the smallest (v7x) if the query fails
    return int(min(96 * 1024 * 1024, cap * 3 // 4))


def separable_conv_block(x_nchw, dw_weight, pw_weight, gamma, beta,
                         *, eps: float = 1e-3, activation: bool = False,
                         max_tile_rows=None):
    """NCHW in / NCHW out wrapper matching the PyTorch module (training-mode BN)."""
    N, C, H, W = x_nchw.shape
    Cp = ((C + LANE - 1) // LANE) * LANE
    orig_dtype = x_nchw.dtype
    is_bf16 = orig_dtype == jnp.bfloat16
    y_dtype = jnp.bfloat16 if is_bf16 else jnp.float32      # halved intermediate traffic on bf16
    pw_dtype = jnp.bfloat16 if is_bf16 else jnp.float32     # bf16 MXU path on bf16

    vmem_limit = _vmem_limit_bytes()
    ix = x_nchw.dtype.itemsize
    iy = jnp.dtype(y_dtype).itemsize
    ipw = jnp.dtype(pw_dtype).itemsize

    # ---- derive TILE_H from the VMEM byte budget --------------------------------------
    # Counts double-buffered x / y / halo blocks, the resident pointwise weight and
    # ~6 full-slab f32 temporaries (xf, x_l, x_r, acc, matmul operand/result).
    fixed = 2 * Cp * Cp * ipw + 2 * 9 * Cp * 4 + 2 * (2 * W) * Cp * ix + (4 << 20)
    budget = max(vmem_limit - fixed, 2 << 20)
    per_row = Cp * (2 * ix + 2 * iy + 6 * 4)
    rows_cap = min(budget // per_row, 2048)        # 512-2048 flattened rows ~ HBM roofline
    if max_tile_rows is not None:
        rows_cap = min(rows_cap, max_tile_rows)
    th_max = max(1, rows_cap // W)
    cand = [t for t in range(1, H + 1)
            if H % t == 0 and (t * W) % 8 == 0 and t <= th_max]
    TH = max(cand) if cand else H      # TODO(synk): row-masked pl.cdiv tiling if H has no aligned divisor
    nH = H // TH
    TW = TH * W

    # NCHW -> NHWC, zero-pad channels to a lane-dense multiple of 128.
    # TODO(synk): accept/produce channels-last (already Cp-padded) tensors at the block
    # boundary to drop these wrapper-side layout copies for memory-bound cases.
    x_nhwc = jnp.transpose(x_nchw, (0, 2, 3, 1))
    x_p = jnp.pad(x_nhwc, ((0, 0), (0, 0), (0, 0), (0, Cp - C)))

    # Per-tile halo rows: image row h*TH-1 (above) and (h+1)*TH (below), zeros at edges.
    zrow = jnp.zeros((N, 1, W, Cp), x_p.dtype)
    top = jnp.concatenate([zrow, x_p[:, TH - 1:H - 1:TH]], axis=1)          # (N, nH, W, Cp)
    bot = jnp.concatenate([x_p[:, TH:H:TH], zrow], axis=1)                  # (N, nH, W, Cp)
    halo = jnp.concatenate([top[:, :, None], bot[:, :, None]], axis=2)      # (N, nH, 2, W, Cp)
    halo = halo.reshape(N, nH, 2 * W, Cp)

    x_flat = x_p.reshape(N, H * W, Cp)

    # Weights, channel-padded: depthwise (C,1,3,3) -> (9, Cp); pointwise (Cout,Cin,1,1) -> (Cin, Cout).
    dw9 = jnp.pad(jnp.transpose(dw_weight[:, 0, :, :], (1, 2, 0)).reshape(9, C),
                  ((0, 0), (0, Cp - C))).astype(jnp.float32)
    pw = jnp.pad(jnp.transpose(pw_weight[:, :, 0, 0], (1, 0)),
                 ((0, Cp - C), (0, Cp - C))).astype(pw_dtype)

    cparams1 = pltpu.CompilerParams(
        dimension_semantics=("parallel", "parallel"),
        vmem_limit_bytes=vmem_limit)

    # ---- pass 1: conv + per-tile BN partial sums --------------------------------------
    y, stats = pl.pallas_call(
        functools.partial(_dwpw_conv_kernel, W=W),
        grid=(N, nH),
        in_specs=[
            pl.BlockSpec((1, TW, Cp), lambda n, h: (n, h, 0)),
            pl.BlockSpec((1, 1, 2 * W, Cp), lambda n, h: (n, h, 0, 0)),
            pl.BlockSpec((9, Cp), lambda n, h: (0, 0)),
            pl.BlockSpec((Cp, Cp), lambda n, h: (0, 0)),
        ],
        out_specs=(
            pl.BlockSpec((1, TW, Cp), lambda n, h: (n, h, 0)),
            pl.BlockSpec((1, 2, Cp), lambda n, h: (n * nH + h, 0, 0)),
        ),
        out_shape=(
            jax.ShapeDtypeStruct((N, H * W, Cp), y_dtype),
            jax.ShapeDtypeStruct((N * nH, 2, Cp), jnp.float32),
        ),
        compiler_params=cparams1,
    )(x_flat, halo, dw9, pw)

    # ---- tiny reduction of BN partials -> folded scale/shift (plain JAX) --------------
    count = N * H * W
    tot = jnp.sum(stats, axis=0)                     # (2, Cp)
    mean = tot[0] / count
    var = jnp.maximum(tot[1] / count - mean * mean, 0.0)   # biased variance (BN training)
    # TODO(synk): switch to a shifted/Welford-style reduction for very large activations.
    inv = jax.lax.rsqrt(var + eps)
    gamma_p = jnp.pad(gamma.astype(jnp.float32), (0, Cp - C))
    beta_p = jnp.pad(beta.astype(jnp.float32), (0, Cp - C))
    scale = (gamma_p * inv).reshape(1, Cp)
    shift = (beta_p - mean * gamma_p * inv).reshape(1, Cp)

    # ---- pass 2: own 1-D tiling over flattened rows (no halo needed) ------------------
    total_rows = N * H * W
    per_row2 = Cp * (2 * iy + 2 * ix + 8)
    cap2 = int(min(max(budget // per_row2, 8), 8192))
    cand2 = [r for r in range(1, min(cap2, total_rows) + 1)
             if total_rows % r == 0 and r % 8 == 0]
    R2 = max(cand2) if cand2 else total_rows
    n2 = total_rows // R2

    cparams2 = pltpu.CompilerParams(
        dimension_semantics=("parallel",),
        vmem_limit_bytes=vmem_limit)

    out_flat = pl.pallas_call(
        functools.partial(_bn_act_kernel, activation=activation),
        grid=(n2,),
        in_specs=[
            pl.BlockSpec((R2, Cp), lambda i: (i, 0)),
            pl.BlockSpec((1, Cp), lambda i: (0, 0)),
            pl.BlockSpec((1, Cp), lambda i: (0, 0)),
        ],
        out_specs=pl.BlockSpec((R2, Cp), lambda i: (i, 0)),
        out_shape=jax.ShapeDtypeStruct((total_rows, Cp), orig_dtype),
        compiler_params=cparams2,
    )(y.reshape(total_rows, Cp), scale, shift)

    out = out_flat.reshape(N, H, W, Cp)[..., :C]
    return jnp.transpose(out, (0, 3, 1, 2))          # back to NCHW


def _reference(x, dw_weight, pw_weight, gamma, beta, *, eps, activation):
    """Pure-JAX reference mirroring the PyTorch forward (training-mode BN)."""
    C = x.shape[1]
    y = jax.lax.conv_general_dilated(
        x, dw_weight, (1, 1), ((1, 1), (1, 1)),
        dimension_numbers=('NCHW', 'OIHW', 'NCHW'), feature_group_count=C)
    y = jax.lax.conv_general_dilated(
        y, pw_weight, (1, 1), 'VALID',
        dimension_numbers=('NCHW', 'OIHW', 'NCHW'))
    mean = jnp.mean(y, axis=(0, 2, 3), keepdims=True)
    var = jnp.mean((y - mean) ** 2, axis=(0, 2, 3), keepdims=True)
    y = (y - mean) / jnp.sqrt(var + eps)
    y = y * gamma.reshape(1, C, 1, 1) + beta.reshape(1, C, 1, 1)
    if activation:
        y = y * jax.nn.sigmoid(y)
    return y


if __name__ == "__main__":
    N, C, H, W = 2, 4, 16, 16
    eps = 1e-3                      # BatchNorm2d(channels, 0.001, 0.01) -> eps = 0.001

    key = jax.random.PRNGKey(0)
    kx, kdw, kpw, kg, kb = jax.random.split(key, 5)

    x = jax.random.normal(kx, (N, C, H, W), dtype=jnp.float32)
    dw_weight = jax.random.normal(kdw, (C, 1, 3, 3), dtype=jnp.float32) * 0.2
    pw_weight = jax.random.normal(kpw, (C, C, 1, 1), dtype=jnp.float32) * 0.2
    gamma = 1.0 + 0.1 * jax.random.normal(kg, (C,), dtype=jnp.float32)
    beta = 0.1 * jax.random.normal(kb, (C,), dtype=jnp.float32)

    ok = True

    # f32 path: with/without SiLU, budget-derived single tile and forced multi-tile
    # (max_tile_rows=64 -> TH=4, nH=4 so the halo-row path is exercised too).
    for act in (False, True):
        for max_rows in (None, 64):
            run = jax.jit(functools.partial(separable_conv_block, eps=eps,
                                            activation=act, max_tile_rows=max_rows))
            out = jax.block_until_ready(run(x, dw_weight, pw_weight, gamma, beta))
            ref = _reference(x, dw_weight, pw_weight, gamma, beta, eps=eps, activation=act)
            assert out.shape == (N, C, H, W)
            ok &= bool(jnp.allclose(out, ref, atol=1e-3, rtol=1e-3))

    # bf16 activation path: bf16 intermediate y + native bf16 MXU pointwise matmul.
    x_bf16 = x.astype(jnp.bfloat16)
    run = jax.jit(functools.partial(separable_conv_block, eps=eps, activation=True))
    out_bf = jax.block_until_ready(run(x_bf16, dw_weight, pw_weight, gamma, beta))
    ref_bf = _reference(x_bf16.astype(jnp.float32), dw_weight, pw_weight, gamma, beta,
                        eps=eps, activation=True)
    assert out_bf.shape == (N, C, H, W) and out_bf.dtype == jnp.bfloat16
    ok &= bool(jnp.allclose(out_bf.astype(jnp.float32), ref_bf, atol=0.25, rtol=0.05))

    assert ok, "mismatch vs reference"
    print("KERNEL_OK")
</pallas_src>

<mosaic_0001>
module attributes {stable_mosaic.version = 11 : i64} {
  func.func @_dwpw_conv_kernel(%arg0: i32, %arg1: i32, %arg2: memref<1x256x128xf32, #tpu.memory_space<vmem>>, %arg3: memref<1x1x32x128xf32, #tpu.memory_space<vmem>>, %arg4: memref<9x128xf32, #tpu.memory_space<vmem>>, %arg5: memref<128x128xf32, #tpu.memory_space<vmem>>, %arg6: memref<1x256x128xf32, #tpu.memory_space<vmem>>, %arg7: memref<1x2x128xf32, #tpu.memory_space<vmem>>) attributes {dimension_semantics = [#tpu.dimension_semantics<parallel>, #tpu.dimension_semantics<parallel>], iteration_bounds = array<i64: 2, 1>, scalar_prefetch = 0 : i64, scratch_operands = 0 : i64, tpu.core_type = #tpu.core_type<tc>, window_params = [{transform_indices = @transform_0, window_bounds = array<i64: 1, 256, 128>}, {transform_indices = @transform_1, window_bounds = array<i64: 1, 1, 32, 128>}, {pipeline_mode = #tpu.pipeline_mode<synchronous>, transform_indices = @transform_2, window_bounds = array<i64: 9, 128>}, {pipeline_mode = #tpu.pipeline_mode<synchronous>, transform_indices = @transform_3, window_bounds = array<i64: 128, 128>}, {transform_indices = @transform_4, window_bounds = array<i64: 1, 256, 128>}, {transform_indices = @transform_5, window_bounds = array<i64: 1, 2, 128>}]} {
    %c0 = arith.constant 0 : index
    %c0_0 = arith.constant 0 : index
    %c0_1 = arith.constant 0 : index
    %0 = vector.load %arg2[%c0, %c0_0, %c0_1] : memref<1x256x128xf32, #tpu.memory_space<vmem>>, vector<1x256x128xf32>
    %1 = vector.shape_cast %0 : vector<1x256x128xf32> to vector<256x128xf32>
    %c0_2 = arith.constant 0 : index
    %c0_3 = arith.constant 0 : index
    %c0_4 = arith.constant 0 : index
    %c0_5 = arith.constant 0 : index
    %2 = vector.load %arg3[%c0_2, %c0_3, %c0_4, %c0_5] : memref<1x1x32x128xf32, #tpu.memory_space<vmem>>, vector<1x1x32x128xf32>
    %3 = vector.shape_cast %2 : vector<1x1x32x128xf32> to vector<32x128xf32>
    %c0_6 = arith.constant 0 : index
    %c0_7 = arith.constant 0 : index
    %4 = vector.load %arg4[%c0_6, %c0_7] : memref<9x128xf32, #tpu.memory_space<vmem>>, vector<9x128xf32>
    %5 = vector.extract_strided_slice %3 {offsets = [0, 0], sizes = [16, 128], strides = [1, 1]} : vector<32x128xf32> to vector<16x128xf32>
    %6 = vector.extract_strided_slice %3 {offsets = [16, 0], sizes = [16, 128], strides = [1, 1]} : vector<32x128xf32> to vector<16x128xf32>
    %7 = tpu.concatenate %5, %1, %6 in 0 : vector<16x128xf32>, vector<256x128xf32>, vector<16x128xf32> -> vector<288x128xf32>
    %8 = tpu.iota {dimensions = array<i32: 0>} : vector<288x1xi32>
    %c16_i32 = arith.constant 16 : i32
    %c0_i32 = arith.constant 0 : i32
    %9 = arith.cmpi eq, %c16_i32, %c0_i32 : i32
    %c1_i32 = arith.constant 1 : i32
    %10 = arith.select %9, %c1_i32, %c16_i32 : i32
    %11 = vector.broadcast %10 : i32 to vector<288x1xi32>
    %12 = arith.remsi %8, %11 : vector<288x1xi32>
    %c0_i32_8 = arith.constant 0 : i32
    %13 = vector.broadcast %c0_i32_8 : i32 to vector<288x1xi32>
    %14 = arith.cmpi ne, %12, %13 : vector<288x1xi32>
    %c0_i32_9 = arith.constant 0 : i32
    %15 = vector.broadcast %c0_i32_9 : i32 to vector<288x1xi32>
    %16 = arith.cmpi slt, %12, %15 : vector<288x1xi32>
    %c0_i32_10 = arith.constant 0 : i32
    %17 = arith.cmpi slt, %10, %c0_i32_10 : i32
    %18 = vector.broadcast %17 : i1 to vector<288x1xi1>
    %19 = vector.broadcast %18 : vector<288x1xi1> to vector<288x1xi1>
    %20 = arith.xori %16, %19 : vector<288x1xi1>
    %21 = arith.andi %20, %14 : vector<288x1xi1>
    %22 = vector.broadcast %10 : i32 to vector<288x1xi32>
    %23 = arith.addi %12, %22 : vector<288x1xi32>
    %24 = arith.select %21, %23, %12 : vector<288x1xi1>, vector<288x1xi32>
    %c0_i32_11 = arith.constant 0 : i32
    %25 = vector.broadcast %c0_i32_11 : i32 to vector<288x1xi32>
    %26 = arith.cmpi sgt, %24, %25 : vector<288x1xi32>
    %c15_i32 = arith.constant 15 : i32
    %27 = vector.broadcast %c15_i32 : i32 to vector<288x1xi32>
    %28 = arith.cmpi slt, %24, %27 : vector<288x1xi32>
    %c1_i32_12 = arith.constant 1 : i32
    %29 = tpu.dynamic_rotate %7 by %c1_i32_12 dim 0 : vector<288x128xf32>, i32 -> vector<288x128xf32>
    %cst = arith.constant 0.000000e+00 : f32
    %30 = vector.shape_cast %26 : vector<288x1xi1> to vector<288x1xi1>
    %31 = vector.broadcast %30 : vector<288x1xi1> to vector<288x128xi1>
    %32 = vector.broadcast %cst : f32 to vector<288x128xf32>
    %33 = arith.select %31, %29, %32 : vector<288x128xi1>, vector<288x128xf32>
    %c287_i32 = arith.constant 287 : i32
    %34 = tpu.dynamic_rotate %7 by %c287_i32 dim 0 : vector<288x128xf32>, i32 -> vector<288x128xf32>
    %cst_13 = arith.constant 0.000000e+00 : f32
    %35 = vector.shape_cast %28 : vector<288x1xi1> to vector<288x1xi1>
    %36 = vector.broadcast %35 : vector<288x1xi1> to vector<288x128xi1>
    %37 = vector.broadcast %cst_13 : f32 to vector<288x128xf32>
    %38 = arith.select %36, %34, %37 : vector<288x128xi1>, vector<288x128xf32>
    %39 = vector.extract_strided_slice %4 {offsets = [0, 0], sizes = [1, 128], strides = [1, 1]} : vector<9x128xf32> to vector<1x128xf32>
    %40 = vector.shape_cast %39 : vector<1x128xf32> to vector<128xf32>
    %41 = vector.extract_strided_slice %33 {offsets = [0, 0], sizes = [256, 128], strides = [1, 1]} : vector<288x128xf32> to vector<256x128xf32>
    %42 = vector.shape_cast %40 : vector<128xf32> to vector<1x128xf32>
    %43 = vector.broadcast %42 : vector<1x128xf32> to vector<256x128xf32>
    %44 = arith.mulf %43, %41 : vector<256x128xf32>
    %45 = vector.extract_strided_slice %4 {offsets = [1, 0], sizes = [1, 128], strides = [1, 1]} : vector<9x128xf32> to vector<1x128xf32>
    %46 = vector.shape_cast %45 : vector<1x128xf32> to vector<128xf32>
    %47 = vector.extract_strided_slice %7 {offsets = [0, 0], sizes = [256, 128], strides = [1, 1]} : vector<288x128xf32> to vector<256x128xf32>
    %48 = vector.shape_cast %46 : vector<128xf32> to vector<1x128xf32>
    %49 = vector.broadcast %48 : vector<1x128xf32> to vector<256x128xf32>
    %50 = arith.mulf %49, %47 : vector<256x128xf32>
    %51 = arith.addf %44, %50 : vector<256x128xf32>
    %52 = vector.extract_strided_slice %4 {offsets = [2, 0], sizes = [1, 128], strides = [1, 1]} : vector<9x128xf32> to vector<1x128xf32>
    %53 = vector.shape_cast %52 : vector<1x128xf32> to vector<128xf32>
    %54 = vector.extract_strided_slice %38 {offsets = [0, 0], sizes = [256, 128], strides = [1, 1]} : vector<288x128xf32> to vector<256x128xf32>
    %55 = vector.shape_cast %53 : vector<128xf32> to vector<1x128xf32>
    %56 = vector.broadcast %55 : vector<1x128xf32> to vector<256x128xf32>
    %57 = arith.mulf %56, %54 : vector<256x128xf32>
    %58 = arith.addf %51, %57 : vector<256x128xf32>
    %59 = vector.extract_strided_slice %4 {offsets = [3, 0], sizes = [1, 128], strides = [1, 1]} : vector<9x128xf32> to vector<1x128xf32>
    %60 = vector.shape_cast %59 : vector<1x128xf32> to vector<128xf32>
    %61 = vector.extract_strided_slice %33 {offsets = [16, 0], sizes = [256, 128], strides = [1, 1]} : vector<288x128xf32> to vector<256x128xf32>
    %62 = vector.shape_cast %60 : vector<128xf32> to vector<1x128xf32>
    %63 = vector.broadcast %62 : vector<1x128xf32> to vector<256x128xf32>
    %64 = arith.mulf %63, %61 : vector<256x128xf32>
    %65 = arith.addf %58, %64 : vector<256x128xf32>
    %66 = vector.extract_strided_slice %4 {offsets = [4, 0], sizes = [1, 128], strides = [1, 1]} : vector<9x128xf32> to vector<1x128xf32>
    %67 = vector.shape_cast %66 : vector<1x128xf32> to vector<128xf32>
    %68 = vector.extract_strided_slice %7 {offsets = [16, 0], sizes = [256, 128], strides = [1, 1]} : vector<288x128xf32> to vector<256x128xf32>
    %69 = vector.shape_cast %67 : vector<128xf32> to vector<1x128xf32>
    %70 = vector.broadcast %69 : vector<1x128xf32> to vector<256x128xf32>
    %71 = arith.mulf %70, %68 : vector<256x128xf32>
    %72 = arith.addf %65, %71 : vector<256x128xf32>
    %73 = vector.extract_strided_slice %4 {offsets = [5, 0], sizes = [1, 128], strides = [1, 1]} : vector<9x128xf32> to vector<1x128xf32>
    %74 = vector.shape_cast %73 : vector<1x128xf32> to vector<128xf32>
    %75 = vector.extract_strided_slice %38 {offsets = [16, 0], sizes = [256, 128], strides = [1, 1]} : vector<288x128xf32> to vector<256x128xf32>
    %76 = vector.shape_cast %74 : vector<128xf32> to vector<1x128xf32>
    %77 = vector.broadcast %76 : vector<1x128xf32> to vector<256x128xf32>
    %78 = arith.mulf %77, %75 : vector<256x128xf32>
    %79 = arith.addf %72, %78 : vector<256x128xf32>
    %80 = vector.extract_strided_slice %4 {offsets = [6, 0], sizes = [1, 128], strides = [1, 1]} : vector<9x128xf32> to vector<1x128xf32>
    %81 = vector.shape_cast %80 : vector<1x128xf32> to vector<128xf32>
    %82 = vector.extract_strided_slice %33 {offsets = [32, 0], sizes = [256, 128], strides = [1, 1]} : vector<288x128xf32> to vector<256x128xf32>
    %83 = vector.shape_cast %81 : vector<128xf32> to vector<1x128xf32>
    %84 = vector.broadcast %83 : vector<1x128xf32> to vector<256x128xf32>
    %85 = arith.mulf %84, %82 : vector<256x128xf32>
    %86 = arith.addf %79, %85 : vector<256x128xf32>
    %87 = vector.extract_strided_slice %4 {offsets = [7, 0], sizes = [1, 128], strides = [1, 1]} : vector<9x128xf32> to vector<1x128xf32>
    %88 = vector.shape_cast %87 : vector<1x128xf32> to vector<128xf32>
    %89 = vector.extract_strided_slice %7 {offsets = [32, 0], sizes = [256, 128], strides = [1, 1]} : vector<288x128xf32> to vector<256x128xf32>
    %90 = vector.shape_cast %88 : vector<128xf32> to vector<1x128xf32>
    %91 = vector.broadcast %90 : vector<1x128xf32> to vector<256x128xf32>
    %92 = arith.mulf %91, %89 : vector<256x128xf32>
    %93 = arith.addf %86, %92 : vector<256x128xf32>
    %94 = vector.extract_strided_slice %4 {offsets = [8, 0], sizes = [1, 128], strides = [1, 1]} : vector<9x128xf32> to vector<1x128xf32>
    %95 = vector.shape_cast %94 : vector<1x128xf32> to vector<128xf32>
    %96 = vector.extract_strided_slice %38 {offsets = [32, 0], sizes = [256, 128], strides = [1, 1]} : vector<288x128xf32> to vector<256x128xf32>
    %97 = vector.shape_cast %95 : vector<128xf32> to vector<1x128xf32>
    %98 = vector.broadcast %97 : vector<1x128xf32> to vector<256x128xf32>
    %99 = arith.mulf %98, %96 : vector<256x128xf32>
    %100 = arith.addf %93, %99 : vector<256x128xf32>
    %c0_14 = arith.constant 0 : index
    %c0_15 = arith.constant 0 : index
    %101 = vector.load %arg5[%c0_14, %c0_15] : memref<128x128xf32, #tpu.memory_space<vmem>>, vector<128x128xf32>
    %cst_16 = arith.constant dense<0.000000e+00> : vector<256x128xf32>
    %102 = tpu.matmul %100, %101, %cst_16 {dimension_numbers = #tpu.dot_dimension_numbers<[1], [0], [0], [1], [0, 0, 1, 1], [], []>} : vector<256x128xf32>, vector<128x128xf32>, vector<256x128xf32> -> vector<256x128xf32>
    %cst_17 = arith.constant dense<0.000000e+00> : vector<128xf32>
    %103 = vector.multi_reduction <add>, %102, %cst_17 [0] : vector<256x128xf32> to vector<128xf32>
    %104 = vector.shape_cast %103 : vector<128xf32> to vector<1x128xf32>
    %105 = arith.mulf %102, %102 : vector<256x128xf32>
    %cst_18 = arith.constant dense<0.000000e+00> : vector<128xf32>
    %106 = vector.multi_reduction <add>, %105, %cst_18 [0] : vector<256x128xf32> to vector<128xf32>
    %107 = vector.shape_cast %106 : vector<128xf32> to vector<1x128xf32>
    %108 = tpu.concatenate %104, %107 in 0 : vector<1x128xf32>, vector<1x128xf32> -> vector<2x128xf32>
    %c0_19 = arith.constant 0 : index
    %c0_20 = arith.constant 0 : index
    %c0_21 = arith.constant 0 : index
    %109 = vector.load %arg7[%c0_19, %c0_20, %c0_21] : memref<1x2x128xf32, #tpu.memory_space<vmem>>, vector<1x2x128xf32>
    %110 = vector.shape_cast %109 : vector<1x2x128xf32> to vector<2x128xf32>
    %111 = vector.shape_cast %108 : vector<2x128xf32> to vector<1x2x128xf32>
    tpu.vector_store %arg7[%c0_19, %c0_20, %c0_21], %111 {strides = array<i32>} : memref<1x2x128xf32, #tpu.memory_space<vmem>>, vector<1x2x128xf32>,
    %c0_22 = arith.constant 0 : index
    %c0_23 = arith.constant 0 : index
    %c0_24 = arith.constant 0 : index
    %112 = vector.load %arg6[%c0_22, %c0_23, %c0_24] : memref<1x256x128xf32, #tpu.memory_space<vmem>>, vector<1x256x128xf32>
    %113 = vector.shape_cast %112 : vector<1x256x128xf32> to vector<256x128xf32>
    %114 = vector.shape_cast %102 : vector<256x128xf32> to vector<1x256x128xf32>
    tpu.vector_store %arg6[%c0_22, %c0_23, %c0_24], %114 {strides = array<i32>} : memref<1x256x128xf32, #tpu.memory_space<vmem>>, vector<1x256x128xf32>,
    return
  }
  func.func @transform_0(%arg0: i32, %arg1: i32) -> (i32, i32, i32) {
    %c0_i32 = arith.constant 0 : i32
    %c0_i32_0 = arith.constant 0 : i32
    return %arg0, %arg1, %c0_i32 : i32, i32, i32
  }
  func.func @transform_1(%arg0: i32, %arg1: i32) -> (i32, i32, i32, i32) {
    %c0_i32 = arith.constant 0 : i32
    %c0_i32_0 = arith.constant 0 : i32
    %c0_i32_1 = arith.constant 0 : i32
    return %arg0, %arg1, %c0_i32, %c0_i32_0 : i32, i32, i32, i32
  }
  func.func @transform_2(%arg0: i32, %arg1: i32) -> (i32, i32) {
    %c0_i32 = arith.constant 0 : i32
    %c0_i32_0 = arith.constant 0 : i32
    %c0_i32_1 = arith.constant 0 : i32
    return %c0_i32, %c0_i32_0 : i32, i32
  }
  func.func @transform_3(%arg0: i32, %arg1: i32) -> (i32, i32) {
    %c0_i32 = arith.constant 0 : i32
    %c0_i32_0 = arith.constant 0 : i32
    %c0_i32_1 = arith.constant 0 : i32
    return %c0_i32, %c0_i32_0 : i32, i32
  }
  func.func @transform_4(%arg0: i32, %arg1: i32) -> (i32, i32, i32) {
    %c0_i32 = arith.constant 0 : i32
    %c0_i32_0 = arith.constant 0 : i32
    return %arg0, %arg1, %c0_i32 : i32, i32, i32
  }
  func.func @transform_5(%arg0: i32, %arg1: i32) -> (i32, i32, i32) {
    %c1_i32 = arith.constant 1 : i32
    %0 = arith.muli %arg0, %c1_i32 : i32
    %1 = arith.addi %0, %arg1 : i32
    %c0_i32 = arith.constant 0 : i32
    %c0_i32_0 = arith.constant 0 : i32
    %c0_i32_1 = arith.constant 0 : i32
    return %1, %c0_i32, %c0_i32_0 : i32, i32, i32
  }
}

module attributes {stable_mosaic.version = 11 : i64} {
  func.func @_bn_act_kernel(%arg0: i32, %arg1: memref<512x128xf32, #tpu.memory_space<vmem>>, %arg2: memref<1x128xf32, #tpu.memory_space<vmem>>, %arg3: memref<1x128xf32, #tpu.memory_space<vmem>>, %arg4: memref<512x128xf32, #tpu.memory_space<vmem>>) attributes {dimension_semantics = [#tpu.dimension_semantics<parallel>], iteration_bounds = array<i64: 1>, scalar_prefetch = 0 : i64, scratch_operands = 0 : i64, tpu.core_type = #tpu.core_type<tc>, window_params = [{transform_indices = @transform_0, window_bounds = array<i64: 512, 128>}, {pipeline_mode = #tpu.pipeline_mode<synchronous>, transform_indices = @transform_1, window_bounds = array<i64: 1, 128>}, {pipeline_mode = #tpu.pipeline_mode<synchronous>, transform_indices = @transform_2, window_bounds = array<i64: 1, 128>}, {transform_indices = @transform_3, window_bounds = array<i64: 512, 128>}]} {
    %c0 = arith.constant 0 : index
    %c0_0 = arith.constant 0 : index
    %0 = vector.load %arg1[%c0, %c0_0] : memref<512x128xf32, #tpu.memory_space<vmem>>, vector<512x128xf32>
    %c0_1 = arith.constant 0 : index
    %c0_2 = arith.constant 0 : index
    %1 = vector.load %arg2[%c0_1, %c0_2] : memref<1x128xf32, #tpu.memory_space<vmem>>, vector<1x128xf32>
    %2 = vector.broadcast %1 : vector<1x128xf32> to vector<512x128xf32>
    %3 = arith.mulf %0, %2 : vector<512x128xf32>
    %c0_3 = arith.constant 0 : index
    %c0_4 = arith.constant 0 : index
    %4 = vector.load %arg3[%c0_3, %c0_4] : memref<1x128xf32, #tpu.memory_space<vmem>>, vector<1x128xf32>
    %5 = vector.broadcast %4 : vector<1x128xf32> to vector<512x128xf32>
    %6 = arith.addf %3, %5 : vector<512x128xf32>
    %c0_5 = arith.constant 0 : index
    %c0_6 = arith.constant 0 : index
    %7 = vector.load %arg4[%c0_5, %c0_6] : memref<512x128xf32, #tpu.memory_space<vmem>>, vector<512x128xf32>
    tpu.vector_store %arg4[%c0_5, %c0_6], %6 {strides = array<i32>} : memref<512x128xf32, #tpu.memory_space<vmem>>, vector<512x128xf32>,
    return
  }
  func.func @transform_0(%arg0: i32) -> (i32, i32) {
    %c0_i32 = arith.constant 0 : i32
    %c0_i32_0 = arith.constant 0 : i32
    return %arg0, %c0_i32 : i32, i32
  }
  func.func @transform_1(%arg0: i32) -> (i32, i32) {
    %c0_i32 = arith.constant 0 : i32
    %c0_i32_0 = arith.constant 0 : i32
    %c0_i32_1 = arith.constant 0 : i32
    return %c0_i32, %c0_i32_0 : i32, i32
  }
  func.func @transform_2(%arg0: i32) -> (i32, i32) {
    %c0_i32 = arith.constant 0 : i32
    %c0_i32_0 = arith.constant 0 : i32
    %c0_i32_1 = arith.constant 0 : i32
    return %c0_i32, %c0_i32_0 : i32, i32
  }
  func.func @transform_3(%arg0: i32) -> (i32, i32) {
    %c0_i32 = arith.constant 0 : i32
    %c0_i32_0 = arith.constant 0 : i32
    return %arg0, %c0_i32 : i32, i32
  }
}

</mosaic_0001>

<bundles_post_ra>
// kernel: separable_conv_block.3
= control target key start
LH: loop header
LB: loop body
LE: loop exit
PB: predicated region body
PF: predicated region fallthrough
CT: control target
= control target key end

     0   :  { %s832_s0 = inlined_call_operand.vmem [shape: f32[512,128], index: 0, kind: input, shape index: {}]   ;;  %s833_s1 = inlined_call_operand.vmem [shape: f32[1,128], index: 1, kind: input, shape index: {}]   ;;  %s834_s2 = inlined_call_operand.vmem [shape: f32[1,128], index: 2, kind: input, shape index: {}]   ;;  %s835_s3 = inlined_call_operand.vmem [shape: f32[512,128], index: 3, kind: output, shape index: {}]  }
   0x1   :  { %v14_v0 = vld [vmem:[%s832_s0] sm:$0xff]  ;;  %v15_v4 = vld [vmem:[%s832_s0 + $0x8] sm:$0xff]  ;;  %v16_v5 = vld [vmem:[%s832_s0 + $0x10] sm:$0xff] }
   0x2   :  { %v316_v1 = vld [vmem:[%s833_s1] ss:$0 sm:$0xff]  ;;  %v17_v6 = vld [vmem:[%s832_s0 + $0x18] sm:$0xff]  ;;  %v19_v11 = vld [vmem:[%s832_s0 + $0x28] sm:$0xff] }
   0x3   :  { %v321_v2 = vld [vmem:[%s834_s2] ss:$0 sm:$0xff]  ;;  %v85_v3 = vmul.f32 %v316_v1, %v14_v0  ;;  %v86_v7 = vmul.f32 %v316_v1, %v15_v4  ;;  %v87_v8 = vmul.f32 %v316_v1, %v16_v5  ;;  %v88_v9 = vmul.f32 %v316_v1, %v17_v6  ;;  %v20_v12 = vld [vmem:[%s832_s0 + $0x30] sm:$0xff]  ;;  %v21_v17 = vld [vmem:[%s832_s0 + $0x38] sm:$0xff] }
   0x4   :  { %v18_v10 = vld [vmem:[%s832_s0 + $0x20] sm:$0xff]  ;;  %v90_v15 = vmul.f32 %v316_v1, %v19_v11  ;;  %v91_v16 = vmul.f32 %v316_v1, %v20_v12  ;;  %v23_v19 = vld [vmem:[%s832_s0 + $0x48] sm:$0xff]  ;;  %v92_v23 = vmul.f32 %v316_v1, %v21_v17  ;;  %v24_v24 = vld [vmem:[%s832_s0 + $0x50] sm:$0xff] }
   0x5   :  { %v156_v13 = vadd.f32 %v321_v2, %v85_v3  ;;  %v89_v14 = vmul.f32 %v316_v1, %v18_v10  ;;  %v22_v18 = vld [vmem:[%s832_s0 + $0x40] sm:$0xff]  ;;  %v157_v20 = vadd.f32 %v321_v2, %v86_v7  ;;  %v158_v21 = vadd.f32 %v321_v2, %v87_v8  ;;  %v25_v25 = vld [vmem:[%s832_s0 + $0x58] sm:$0xff]  ;;  %v27_v31 = vld [vmem:[%s832_s0 + $0x68] sm:$0xff] }
   0x6   :  { %v159_v22 = vadd.f32 %v321_v2, %v88_v9  ;;  %v26_v26 = vld [vmem:[%s832_s0 + $0x60] sm:$0xff]  ;;  %v161_v28 = vadd.f32 %v321_v2, %v90_v15  ;;  %v162_v29 = vadd.f32 %v321_v2, %v91_v16  ;;  %v93_v30 = vmul.f32 %v316_v1, %v22_v18  ;;  %v28_v32 = vld [vmem:[%s832_s0 + $0x70] sm:$0xff]  ;;  %v29_v33 = vld [vmem:[%s832_s0 + $0x78] sm:$0xff] }
   0x7   :  { %220 = vst [vmem:[%s835_s3] sm:$0xff] %v156_v13  ;;  %v160_v27 = vadd.f32 %v321_v2, %v89_v14  ;;  %221 = vst [vmem:[%s835_s3 + $0x8] sm:$0xff] %v157_v20  ;;  %v163_v34 = vadd.f32 %v321_v2, %v92_v23  ;;  %v94_v35 = vmul.f32 %v316_v1, %v23_v19  ;;  %v30_v38 = vld [vmem:[%s832_s0 + $0x80] sm:$0xff]  ;;  %v31_v43 = vld [vmem:[%s832_s0 + $0x88] sm:$0xff] }
   0x8   :  { %222 = vst [vmem:[%s835_s3 + $0x10] sm:$0xff] %v158_v21  ;;  %223 = vst [vmem:[%s835_s3 + $0x18] sm:$0xff] %v159_v22  ;;  %v95_v36 = vmul.f32 %v316_v1, %v24_v24  ;;  %v96_v37 = vmul.f32 %v316_v1, %v25_v25  ;;  %v164_v39 = vadd.f32 %v321_v2, %v93_v30  ;;  %v32_v44 = vld [vmem:[%s832_s0 + $0x90] sm:$0xff]  ;;  %v33_v45 = vld [vmem:[%s832_s0 + $0x98] sm:$0xff] }
   0x9   :  { %224 = vst [vmem:[%s835_s3 + $0x20] sm:$0xff] %v160_v27  ;;  %225 = vst [vmem:[%s835_s3 + $0x28] sm:$0xff] %v161_v28  ;;  %v97_v40 = vmul.f32 %v316_v1, %v26_v26  ;;  %v98_v41 = vmul.f32 %v316_v1, %v27_v31  ;;  %v99_v42 = vmul.f32 %v316_v1, %v28_v32  ;;  %v34_v50 = vld [vmem:[%s832_s0 + $0xa0] sm:$0xff]  ;;  %v35_v51 = vld [vmem:[%s832_s0 + $0xa8] sm:$0xff] }
   0xa   :  { %226 = vst [vmem:[%s835_s3 + $0x30] sm:$0xff] %v162_v29  ;;  %227 = vst [vmem:[%s835_s3 + $0x38] sm:$0xff] %v163_v34  ;;  %v165_v46 = vadd.f32 %v321_v2, %v94_v35  ;;  %v166_v47 = vadd.f32 %v321_v2, %v95_v36  ;;  %v167_v48 = vadd.f32 %v321_v2, %v96_v37  ;;  %v36_v52 = vld [vmem:[%s832_s0 + $0xb0] sm:$0xff]  ;;  %v37_v57 = vld [vmem:[%s832_s0 + $0xb8] sm:$0xff] }
   0xb   :  { %v100_v49 = vmul.f32 %v316_v1, %v29_v33  ;;  %228 = vst [vmem:[%s835_s3 + $0x40] sm:$0xff] %v164_v39  ;;  %v168_v53 = vadd.f32 %v321_v2, %v97_v40  ;;  %v169_v54 = vadd.f32 %v321_v2, %v98_v41  ;;  %v170_v55 = vadd.f32 %v321_v2, %v99_v42  ;;  %v38_v62 = vld [vmem:[%s832_s0 + $0xc0] sm:$0xff]  ;;  %v39_v5 = vld [vmem:[%s832_s0 + $0xc8] sm:$0xff]  ;;  %v40_v6 = vld [vmem:[%s832_s0 + $0xd0] sm:$0xff] }
   0xc   :  { %v101_v56 = vmul.f32 %v316_v1, %v30_v38  ;;  %229 = vst [vmem:[%s835_s3 + $0x48] sm:$0xff] %v165_v46  ;;  %230 = vst [vmem:[%s835_s3 + $0x50] sm:$0xff] %v166_v47  ;;  %v102_v59 = vmul.f32 %v316_v1, %v31_v43  ;;  %v103_v60 = vmul.f32 %v316_v1, %v32_v44  ;;  %v41_v7 = vld [vmem:[%s832_s0 + $0xd8] sm:$0xff]  ;;  %v42_v12 = vld [vmem:[%s832_s0 + $0xe0] sm:$0xff] }
   0xd   :  { %231 = vst [vmem:[%s835_s3 + $0x58] sm:$0xff] %v167_v48  ;;  %v171_v58 = vadd.f32 %v321_v2, %v100_v49  ;;  %v104_v61 = vmul.f32 %v316_v1, %v33_v45  ;;  %232 = vst [vmem:[%s835_s3 + $0x60] sm:$0xff] %v168_v53  ;;  %v105_v0 = vmul.f32 %v316_v1, %v34_v50  ;;  %v43_v13 = vld [vmem:[%s832_s0 + $0xe8] sm:$0xff]  ;;  %v44_v14 = vld [vmem:[%s832_s0 + $0xf0] sm:$0xff] }
   0xe   :  { %233 = vst [vmem:[%s835_s3 + $0x68] sm:$0xff] %v169_v54  ;;  %234 = vst [vmem:[%s835_s3 + $0x70] sm:$0xff] %v170_v55  ;;  %v172_v63 = vadd.f32 %v321_v2, %v101_v56  ;;  %v106_v3 = vmul.f32 %v316_v1, %v35_v51  ;;  %v107_v4 = vmul.f32 %v316_v1, %v36_v52  ;;  %v45_v19 = vld [vmem:[%s832_s0 + $0xf8] sm:$0xff]  ;;  %v46_v24 = vld [vmem:[%s832_s0 + $0x100] sm:$0xff] }
   0xf   :  { %235 = vst [vmem:[%s835_s3 + $0x78] sm:$0xff] %v171_v58  ;;  %v173_v8 = vadd.f32 %v321_v2, %v102_v59  ;;  %v174_v9 = vadd.f32 %v321_v2, %v103_v60  ;;  %v175_v10 = vadd.f32 %v321_v2, %v104_v61  ;;  %v108_v11 = vmul.f32 %v316_v1, %v37_v57  ;;  %v47_v29 = vld [vmem:[%s832_s0 + $0x108] sm:$0xff]  ;;  %v48_v30 = vld [vmem:[%s832_s0 + $0x110] sm:$0xff]  ;;  %v49_v31 = vld [vmem:[%s832_s0 + $0x118] sm:$0xff] }
  0x10   :  { %236 = vst [vmem:[%s835_s3 + $0x80] sm:$0xff] %v172_v63  ;;  %v176_v15 = vadd.f32 %v321_v2, %v105_v0  ;;  %v177_v16 = vadd.f32 %v321_v2, %v106_v3  ;;  %v178_v17 = vadd.f32 %v321_v2, %v107_v4  ;;  %v109_v18 = vmul.f32 %v316_v1, %v38_v62  ;;  %v50_v36 = vld [vmem:[%s832_s0 + $0x120] sm:$0xff]  ;;  %v51_v37 = vld [vmem:[%s832_s0 + $0x128] sm:$0xff]  ;;  %v52_v38 = vld [vmem:[%s832_s0 + $0x130] sm:$0xff] }
  0x11   :  { %237 = vst [vmem:[%s835_s3 + $0x88] sm:$0xff] %v173_v8  ;;  %238 = vst [vmem:[%s835_s3 + $0x90] sm:$0xff] %v174_v9  ;;  %v179_v20 = vadd.f32 %v321_v2, %v108_v11  ;;  %v110_v21 = vmul.f32 %v316_v1, %v39_v5  ;;  %v111_v22 = vmul.f32 %v316_v1, %v40_v6  ;;  %v53_v43 = vld [vmem:[%s832_s0 + $0x138] sm:$0xff]  ;;  %v54_v48 = vld [vmem:[%s832_s0 + $0x140] sm:$0xff] }
  0x12   :  { %239 = vst [vmem:[%s835_s3 + $0x98] sm:$0xff] %v175_v10  ;;  %v112_v23 = vmul.f32 %v316_v1, %v41_v7  ;;  %240 = vst [vmem:[%s835_s3 + $0xa0] sm:$0xff] %v176_v15  ;;  %v180_v25 = vadd.f32 %v321_v2, %v109_v18  ;;  %v113_v26 = vmul.f32 %v316_v1, %v42_v12  ;;  %v55_v53 = vld [vmem:[%s832_s0 + $0x148] sm:$0xff]  ;;  %v56_v54 = vld [vmem:[%s832_s0 + $0x150] sm:$0xff] }
  0x13   :  { %241 = vst [vmem:[%s835_s3 + $0xa8] sm:$0xff] %v177_v16  ;;  %242 = vst [vmem:[%s835_s3 + $0xb0] sm:$0xff] %v178_v17  ;;  %v114_v27 = vmul.f32 %v316_v1, %v43_v13  ;;  %v115_v28 = vmul.f32 %v316_v1, %v44_v14  ;;  %v181_v32 = vadd.f32 %v321_v2, %v110_v21  ;;  %v57_v55 = vld [vmem:[%s832_s0 + $0x158] sm:$0xff]  ;;  %v58_v60 = vld [vmem:[%s832_s0 + $0x160] sm:$0xff] }
  0x14   :  { %243 = vst [vmem:[%s835_s3 + $0xb8] sm:$0xff] %v179_v20  ;;  %v182_v33 = vadd.f32 %v321_v2, %v111_v22  ;;  %v183_v34 = vadd.f32 %v321_v2, %v112_v23  ;;  %v116_v35 = vmul.f32 %v316_v1, %v45_v19  ;;  %244 = vst [vmem:[%s835_s3 + $0xc0] sm:$0xff] %v180_v25  ;;  %v59_v61 = vld [vmem:[%s832_s0 + $0x168] sm:$0xff]  ;;  %v60_v62 = vld [vmem:[%s832_s0 + $0x170] sm:$0xff] }
  0x15   :  { %v184_v39 = vadd.f32 %v321_v2, %v113_v26  ;;  %v185_v40 = vadd.f32 %v321_v2, %v114_v27  ;;  %v186_v41 = vadd.f32 %v321_v2, %v115_v28  ;;  %v117_v42 = vmul.f32 %v316_v1, %v46_v24  ;;  %245 = vst [vmem:[%s835_s3 + $0xc8] sm:$0xff] %v181_v32  ;;  %v61_v5 = vld [vmem:[%s832_s0 + $0x178] sm:$0xff]  ;;  %v62_v10 = vld [vmem:[%s832_s0 + $0x180] sm:$0xff]  ;;  %v63_v15 = vld [vmem:[%s832_s0 + $0x188] sm:$0xff] }
  0x16   :  { %246 = vst [vmem:[%s835_s3 + $0xd0] sm:$0xff] %v182_v33  ;;  %247 = vst [vmem:[%s835_s3 + $0xd8] sm:$0xff] %v183_v34  ;;  %v187_v44 = vadd.f32 %v321_v2, %v116_v35  ;;  %v118_v45 = vmul.f32 %v316_v1, %v47_v29  ;;  %v119_v46 = vmul.f32 %v316_v1, %v48_v30  ;;  %v64_v16 = vld [vmem:[%s832_s0 + $0x190] sm:$0xff]  ;;  %v65_v17 = vld [vmem:[%s832_s0 + $0x198] sm:$0xff] }
  0x17   :  { %v120_v47 = vmul.f32 %v316_v1, %v49_v31  ;;  %248 = vst [vmem:[%s835_s3 + $0xe0] sm:$0xff] %v184_v39  ;;  %249 = vst [vmem:[%s835_s3 + $0xe8] sm:$0xff] %v185_v40  ;;  %v188_v49 = vadd.f32 %v321_v2, %v117_v42  ;;  %v121_v50 = vmul.f32 %v316_v1, %v50_v36  ;;  %v66_v22 = vld [vmem:[%s832_s0 + $0x1a0] sm:$0xff]  ;;  %v67_v23 = vld [vmem:[%s832_s0 + $0x1a8] sm:$0xff] }
  0x18   :  { %250 = vst [vmem:[%s835_s3 + $0xf0] sm:$0xff] %v186_v41  ;;  %v122_v51 = vmul.f32 %v316_v1, %v51_v37  ;;  %v123_v52 = vmul.f32 %v316_v1, %v52_v38  ;;  %251 = vst [vmem:[%s835_s3 + $0xf8] sm:$0xff] %v187_v44  ;;  %v189_v56 = vadd.f32 %v321_v2, %v118_v45  ;;  %v68_v24 = vld [vmem:[%s832_s0 + $0x1b0] sm:$0xff]  ;;  %v69_v29 = vld [vmem:[%s832_s0 + $0x1b8] sm:$0xff] }
  0x19   :  { %v190_v57 = vadd.f32 %v321_v2, %v119_v46  ;;  %v191_v58 = vadd.f32 %v321_v2, %v120_v47  ;;  %v124_v59 = vmul.f32 %v316_v1, %v53_v43  ;;  %252 = vst [vmem:[%s835_s3 + $0x100] sm:$0xff] %v188_v49  ;;  %v192_v63 = vadd.f32 %v321_v2, %v121_v50  ;;  %v70_v34 = vld [vmem:[%s832_s0 + $0x1c0] sm:$0xff]  ;;  %v71_v39 = vld [vmem:[%s832_s0 + $0x1c8] sm:$0xff]  ;;  %v72_v40 = vld [vmem:[%s832_s0 + $0x1d0] sm:$0xff] }
  0x1a   :  { %v193_v0 = vadd.f32 %v321_v2, %v122_v51  ;;  %v194_v3 = vadd.f32 %v321_v2, %v123_v52  ;;  %v125_v4 = vmul.f32 %v316_v1, %v54_v48  ;;  %253 = vst [vmem:[%s835_s3 + $0x108] sm:$0xff] %v189_v56  ;;  %v126_v7 = vmul.f32 %v316_v1, %v55_v53  ;;  %v73_v41 = vld [vmem:[%s832_s0 + $0x1d8] sm:$0xff]  ;;  %v74_v46 = vld [vmem:[%s832_s0 + $0x1e0] sm:$0xff]  ;;  %v75_v47 = vld [vmem:[%s832_s0 + $0x1e8] sm:$0xff] }
  0x1b   :  { %254 = vst [vmem:[%s835_s3 + $0x110] sm:$0xff] %v190_v57  ;;  %255 = vst [vmem:[%s835_s3 + $0x118] sm:$0xff] %v191_v58  ;;  %v195_v6 = vadd.f32 %v321_v2, %v124_v59  ;;  %v127_v8 = vmul.f32 %v316_v1, %v56_v54  ;;  %v128_v9 = vmul.f32 %v316_v1, %v57_v55  ;;  %v76_v48 = vld [vmem:[%s832_s0 + $0x1f0] sm:$0xff]  ;;  %v77_v53 = vld [vmem:[%s832_s0 + $0x1f8] sm:$0xff] }
  0x1c   :  { %256 = vst [vmem:[%s835_s3 + $0x120] sm:$0xff] %v192_v63  ;;  %257 = vst [vmem:[%s835_s3 + $0x128] sm:$0xff] %v193_v0  ;;  %v196_v11 = vadd.f32 %v321_v2, %v125_v4  ;;  %v129_v12 = vmul.f32 %v316_v1, %v58_v60  ;;  %v130_v13 = vmul.f32 %v316_v1, %v59_v61 }
  0x1d   :  { %258 = vst [vmem:[%s835_s3 + $0x130] sm:$0xff] %v194_v3  ;;  %v131_v14 = vmul.f32 %v316_v1, %v60_v62  ;;  %259 = vst [vmem:[%s835_s3 + $0x138] sm:$0xff] %v195_v6  ;;  %v197_v18 = vadd.f32 %v321_v2, %v126_v7  ;;  %v198_v19 = vadd.f32 %v321_v2, %v127_v8 }
  0x1e   :  { %v199_v20 = vadd.f32 %v321_v2, %v128_v9  ;;  %v132_v21 = vmul.f32 %v316_v1, %v61_v5  ;;  %260 = vst [vmem:[%s835_s3 + $0x140] sm:$0xff] %v196_v11  ;;  %v200_v25 = vadd.f32 %v321_v2, %v129_v12  ;;  %v201_v26 = vadd.f32 %v321_v2, %v130_v13 }
  0x1f   :  { %v202_v27 = vadd.f32 %v321_v2, %v131_v14  ;;  %v133_v28 = vmul.f32 %v316_v1, %v62_v10  ;;  %261 = vst [vmem:[%s835_s3 + $0x148] sm:$0xff] %v197_v18  ;;  %262 = vst [vmem:[%s835_s3 + $0x150] sm:$0xff] %v198_v19  ;;  %v134_v31 = vmul.f32 %v316_v1, %v63_v15 }
  0x20   :  { %263 = vst [vmem:[%s835_s3 + $0x158] sm:$0xff] %v199_v20  ;;  %v203_v30 = vadd.f32 %v321_v2, %v132_v21  ;;  %v135_v32 = vmul.f32 %v316_v1, %v64_v16  ;;  %v136_v33 = vmul.f32 %v316_v1, %v65_v17  ;;  %264 = vst [vmem:[%s835_s3 + $0x160] sm:$0xff] %v200_v25 }
  0x21   :  { %265 = vst [vmem:[%s835_s3 + $0x168] sm:$0xff] %v201_v26  ;;  %266 = vst [vmem:[%s835_s3 + $0x170] sm:$0xff] %v202_v27  ;;  %v204_v35 = vadd.f32 %v321_v2, %v133_v28  ;;  %v137_v36 = vmul.f32 %v316_v1, %v66_v22  ;;  %v138_v37 = vmul.f32 %v316_v1, %v67_v23 }
  0x22   :  { %v139_v38 = vmul.f32 %v316_v1, %v68_v24  ;;  %267 = vst [vmem:[%s835_s3 + $0x178] sm:$0xff] %v203_v30  ;;  %v205_v42 = vadd.f32 %v321_v2, %v134_v31  ;;  %v206_v43 = vadd.f32 %v321_v2, %v135_v32  ;;  %v207_v44 = vadd.f32 %v321_v2, %v136_v33 }
  0x23   :  { %v140_v45 = vmul.f32 %v316_v1, %v69_v29  ;;  %268 = vst [vmem:[%s835_s3 + $0x180] sm:$0xff] %v204_v35  ;;  %v208_v49 = vadd.f32 %v321_v2, %v137_v36  ;;  %v209_v50 = vadd.f32 %v321_v2, %v138_v37  ;;  %v141_v52 = vmul.f32 %v316_v1, %v70_v34 }
  0x24   :  { %v210_v51 = vadd.f32 %v321_v2, %v139_v38  ;;  %269 = vst [vmem:[%s835_s3 + $0x188] sm:$0xff] %v205_v42  ;;  %270 = vst [vmem:[%s835_s3 + $0x190] sm:$0xff] %v206_v43  ;;  %v142_v55 = vmul.f32 %v316_v1, %v71_v39  ;;  %v143_v56 = vmul.f32 %v316_v1, %v72_v40 }
  0x25   :  { %271 = vst [vmem:[%s835_s3 + $0x198] sm:$0xff] %v207_v44  ;;  %v211_v54 = vadd.f32 %v321_v2, %v140_v45  ;;  %v144_v57 = vmul.f32 %v316_v1, %v73_v41  ;;  %272 = vst [vmem:[%s835_s3 + $0x1a0] sm:$0xff] %v208_v49  ;;  %v212_v58 = vadd.f32 %v321_v2, %v141_v52 }
  0x26   :  { %273 = vst [vmem:[%s835_s3 + $0x1a8] sm:$0xff] %v209_v50  ;;  %274 = vst [vmem:[%s835_s3 + $0x1b0] sm:$0xff] %v210_v51  ;;  %v145_v59 = vmul.f32 %v316_v1, %v74_v46  ;;  %v146_v60 = vmul.f32 %v316_v1, %v75_v47  ;;  %v147_v61 = vmul.f32 %v316_v1, %v76_v48 }
  0x27   :  { %275 = vst [vmem:[%s835_s3 + $0x1b8] sm:$0xff] %v211_v54  ;;  %v213_v62 = vadd.f32 %v321_v2, %v142_v55  ;;  %v214_v63 = vadd.f32 %v321_v2, %v143_v56  ;;  %v215_v0 = vadd.f32 %v321_v2, %v144_v57  ;;  %v148_v3 = vmul.f32 %v316_v1, %v77_v53 }
  0x28   :  { %276 = vst [vmem:[%s835_s3 + $0x1c0] sm:$0xff] %v212_v58  ;;  %v216_v4 = vadd.f32 %v321_v2, %v145_v59  ;;  %v217_v5 = vadd.f32 %v321_v2, %v146_v60  ;;  %v218_v6 = vadd.f32 %v321_v2, %v147_v61 }
  0x29   :  { %277 = vst [vmem:[%s835_s3 + $0x1c8] sm:$0xff] %v213_v62  ;;  %278 = vst [vmem:[%s835_s3 + $0x1d0] sm:$0xff] %v214_v63  ;;  %v219_v1 = vadd.f32 %v321_v2, %v148_v3 }
  0x2a   :  { %279 = vst [vmem:[%s835_s3 + $0x1d8] sm:$0xff] %v215_v0  ;;  %280 = vst [vmem:[%s835_s3 + $0x1e0] sm:$0xff] %v216_v4 }
  0x2b   :  { %281 = vst [vmem:[%s835_s3 + $0x1e8] sm:$0xff] %v217_v5  ;;  %282 = vst [vmem:[%s835_s3 + $0x1f0] sm:$0xff] %v218_v6 }
  0x2c   :  { %283 = vst [vmem:[%s835_s3 + $0x1f8] sm:$0xff] %v219_v1 }

// kernel: separable_conv_block.2
= control target key start
LH: loop header
LB: loop body
LE: loop exit
PB: predicated region body
PF: predicated region fallthrough
CT: control target
= control target key end

     0   :  { %s2633_s18 = smov 0   ;;  %s2635_s19 = smov 0   ;;  %s3733_s0 = inlined_call_operand.vmem [shape: f32[2,256,128], index: 0, kind: input, shape index: {}]   ;;  %s3734_s1 = inlined_call_operand.vmem [shape: f32[2,1,32,128], index: 1, kind: input, shape index: {}]   ;;  %s3735_s2 = inlined_call_operand.vmem [shape: f32[9,128], index: 2, kind: input, shape index: {}]   ;;  %s3736_s3 = inlined_call_operand.vmem [shape: f32[128,128], index: 3, kind: input, shape index: {}]   ;;  %s3737_s4 = inlined_call_operand.vmem [shape: f32[2,256,128], index: 4, kind: output, shape index: {0}]   ;;  %s3738_s5 = inlined_call_operand.vmem [shape: f32[2,2,128], index: 5, kind: output, shape index: {1}]  }
   0x1   :  { %s2637_s20 = smov 0  }
   0x2 LB: > { %s28_s21 = sadd.s32 1, %s2597_s19  ;;  %p2363_p0 = scmp.ge.s32.totalorder %s2601_s20, 1  ;;  %s2601_s20 = sphi %s2637_s20, %s16_s20   ;;  %s2597_s19 = sphi %s2635_s19, %s3750_s19   ;;  %s2593_s18 = sphi %s2633_s18, %s3749_s18  }
   0x3   : > { %p30_p1 = scmp.ge.s32.totalorder %s28_s21, 2  ;;  %p229_p2 = scmp.lt.s32.totalorder %s2601_s20, 3 }
   0x5   : > { %s3752_s21 = smov (%p30_p1, %s28_s21), 0  ;;  %p230_p3 = pnand %p2363_p0, %p229_p2 }
   0x6   : > { %v1835_v0 = vld [vmem:[%s3736_s3] sm:$0xff] (!%p230_p3)  ;;  %v1836_v1 = vld [vmem:[%s3736_s3 + $0x8] sm:$0xff] (!%p230_p3)  ;;  %v1837_v2 = vld [vmem:[%s3736_s3 + $0x10] sm:$0xff] (!%p230_p3)  ;;  %p280_p4 = scmp.lt.s32.totalorder (!%p230_p3), %s2593_s18, 1  ;;  %v352_v3 = vlaneseq (!%p230_p3) }
   0x7   : > { %233 = sbr.rel (%p230_p3) target bundleno = 464 (0x1d0), region = 36  ;;  %v2505_v4 = vpack.c.bf16 (!%p230_p3), %v1836_v1, %v1835_v0  ;;  %v1838_v5 = vld [vmem:[%s3736_s3 + $0x18] sm:$0xff] (!%p230_p3)  ;;  %v1839_v6 = vld [vmem:[%s3736_s3 + $0x20] sm:$0xff] (!%p230_p3)  ;;  %v1840_v8 = vld [vmem:[%s3736_s3 + $0x28] sm:$0xff] (!%p230_p3) }
   0x8   : > { %v2509_v7 = vpack.c.bf16 (!%p230_p3), %v1838_v5, %v1837_v2  ;;  %v1841_v9 = vld [vmem:[%s3736_s3 + $0x30] sm:$0xff] (!%p230_p3)  ;;  %v1842_v10 = vld [vmem:[%s3736_s3 + $0x38] sm:$0xff] (!%p230_p3)  ;;  %v2677_v11 = vshrl.u32 (!%p230_p3), %v352_v3, 7  ;;  %v1843_v12 = vld [vmem:[%s3736_s3 + $0x40] sm:$0xff] (!%p230_p3)  ;;  %v2513_v19 = vpack.c.bf16 (!%p230_p3), %v1840_v8, %v1839_v6 }
   0x9   : > { %2506 = vmatprep.subr.bf16.mxu0 (!%p230_p3), %v2505_v4  ;;  %v1844_v13 = vld [vmem:[%s3736_s3 + $0x48] sm:$0xff] (!%p230_p3)  ;;  %v1845_v14 = vld [vmem:[%s3736_s3 + $0x50] sm:$0xff] (!%p230_p3)  ;;  %2537 = vmatprep.subr.bf16.mxu1 (!%p230_p3), %v2505_v4  ;;  %v1846_v15 = vld [vmem:[%s3736_s3 + $0x58] sm:$0xff] (!%p230_p3)  ;;  %v2517_v24 = vpack.c.bf16 (!%p230_p3), %v1842_v10, %v1841_v9 }
   0xa   : > { %2508 = vmatpush3.bf16.msra.mxu0 (!%p230_p3), %v2505_v4  ;;  %v1847_v16 = vld [vmem:[%s3736_s3 + $0x60] sm:$0xff] (!%p230_p3)  ;;  %v1848_v17 = vld [vmem:[%s3736_s3 + $0x68] sm:$0xff] (!%p230_p3)  ;;  %v355_v18 = vadd.s32 (!%p230_p3), 16, %v2677_v11  ;;  %2545 = vmatpush3.bf16.msra.mxu1 (!%p230_p3), %v2505_v4  ;;  %v1849_v20 = vld [vmem:[%s3736_s3 + $0x70] sm:$0xff] (!%p230_p3)  ;;  %v357_v22 = vadd.s32 (!%p230_p3), 32, %v2677_v11  ;;  %v359_v23 = vadd.s32 (!%p230_p3), 48, %v2677_v11  ;;  %v2720_v25 = vpack.c.bf16 (!%p230_p3), %v1844_v13, %v1843_v12 }
   0xb   : > { %2510 = vmatprep.subr.bf16.mxu0 (!%p230_p3), %v2509_v7  ;;  %v1850_v21 = vld [vmem:[%s3736_s3 + $0x78] sm:$0xff] (!%p230_p3)  ;;  %2538 = vmatprep.subr.bf16.mxu1 (!%p230_p3), %v2509_v7  ;;  %v393_v28 = vand.u32 (!%p230_p3), 15, %v2677_v11  ;;  %v2729_v30 = vpack.c.bf16 (!%p230_p3), %v1846_v15, %v1845_v14  ;;  %v2731_v31 = vpack.c.bf16 (!%p230_p3), %v1848_v17, %v1847_v16  ;;  %vm929_vm0 = vcmp.lt.s32.totalorder (!%p230_p3), %v2677_v11, 1  ;;  %v2802_v59 = vld [vmem:[%s3735_s2] sm:$0xff] (!%p230_p3) }
   0xc   : > { %v407_v29 = vand.u32 (!%p230_p3), 15, %v355_v18  ;;  %v421_v35 = vand.u32 (!%p230_p3), 15, %v357_v22  ;;  %v2743_v37 = vpack.c.bf16 (!%p230_p3), %v1850_v21, %v1849_v20  ;;  %v435_v41 = vand.u32 (!%p230_p3), 15, %v359_v23 }
   0xd   : > { %vm2756_vm1 = vcmp.gt.s32.totalorder (!%p230_p3), %v393_v28, 0  ;;  %vm1110_vm5 = vcmp.lt.s32.totalorder (!%p230_p3), %v2677_v11, 7  ;;  %v1257_v1 = vsub.s32 (!%p230_p3), 0, %v2677_v11  ;;  %v1293_v2 = vsub.s32 (!%p230_p3), 1, %v2677_v11 }
   0xe   : > { %s3754_s18 = smov (!%p280_p4, %s2593_s18), 1  ;;  %2512 = vmatpush3.bf16.msra.mxu0 %v2509_v7  ;;  %2546 = vmatpush3.bf16.msra.mxu1 %v2509_v7  ;;  %vm2760_vm2 = vcmp.gt.s32.totalorder %v407_v29, 0  ;;  %vm2766_vm3 = vcmp.gt.s32.totalorder %v421_v35, 0  ;;  %vm2782_vm4 = vcmp.gt.s32.totalorder %v435_v41, 0  ;;  %v1361_v10 = vsub.s32 2, %v2677_v11 }
   0xf   : > { %s2374_s29 = sshll.u32 %s3754_s18, 8  ;;  %s2375_s30 = sshll.u32 %s3754_s18, 5  ;;  %2514 = vmatprep.subr.bf16.mxu0 %v2513_v19  ;;  %2539 = vmatprep.subr.bf16.mxu1 %v2513_v19  ;;  %v2835_v8 = vrot.slane %v2802_v59, %v1257_v1  ;;  %v2838_v9 = vrot.slane %v2802_v59, %v1293_v2  ;;  %v1429_v12 = vsub.s32 3, %v2677_v11  ;;  %v1497_v13 = vsub.s32 4, %v2677_v11 }
  0x10   : > { %s2711_s12 = scalar_lea.vmem %s3733_s0, %s2374_s29  ;;  %s2716_s15 = scalar_lea.vmem %s3734_s1, %s2375_s30  ;;  %v1565_v14 = vsub.s32 5, %v2677_v11  ;;  %v1633_v15 = vsub.s32 6, %v2677_v11  ;;  %v2857_v22 = vrot.slane %v2802_v59, %v1361_v10 }
  0x11   : > { %v2723_v26 = vld [vmem:[%s2711_s12] sm:$0xff]  ;;  %v2726_v27 = vld [vmem:[%s2711_s12 + $0x10] sm:$0xff]  ;;  %v2734_v32 = vld [vmem:[%s2711_s12 + $0x8] sm:$0xff]  ;;  %v2860_v23 = vrot.slane %v2802_v59, %v1429_v12  ;;  %v2868_v29 = vrot.slane %v2802_v59, %v1497_v13  ;;  %s3686_s28 = scalar_lea.vmem %s3737_s4, %s2374_s29  ;;  %s2370_s29 = sshll.u32 %s3754_s18, 1 }
  0x12   : > { %v2737_v33 = vld [vmem:[%s2711_s12 + $0x20] sm:$0xff]  ;;  %v895_v36 = vrot.slane %v2723_v26, 7  ;;  %v2746_v38 = vld [vmem:[%s2711_s12 + $0x18] sm:$0xff]  ;;  %v2749_v39 = vld [vmem:[%s2716_s15 + $0x8] sm:$0xff]  ;;  %v897_v46 = vrot.slane %v2726_v27, 7  ;;  %v896_v48 = vrot.slane %v2734_v32, 7  ;;  %2516 = vmatpush3.bf16.msra.mxu0 %v2513_v19  ;;  %2547 = vmatpush3.bf16.msra.mxu1 %v2513_v19  ;;  %v1297_v20 = vmul.f32 %v2838_v9, %v2723_v26  ;;  %s312_s7 = scalar_lea.vmem %s3738_s5, %s2370_s29 }
  0x13   : > { %v2740_v34 = vld [vmem:[%s2716_s15] sm:$0xff]  ;;  %v2752_v40 = vld [vmem:[%s2716_s15 + $0x18] sm:$0xff]  ;;  %v894_v45 = vrot.slane %v2749_v39, 7  ;;  %v899_v49 = vrot.slane %v2737_v33, 7  ;;  %v898_v51 = vrot.slane %v2746_v38, 7  ;;  %v1075_v54 = vrot.slane %v2749_v39, 1  ;;  %2518 = vmatprep.subr.bf16.mxu0 %v2517_v24  ;;  %2540 = vmatprep.subr.bf16.mxu1 %v2517_v24 }
  0x14   : > { %v893_v42 = vrot.slane %v2740_v34, 7  ;;  %v928_v50 = vrot.slane %v2752_v40, 7  ;;  %v1074_v53 = vrot.slane %v2740_v34, 1  ;;  %v961_v56 = vsel %vm929_vm0, %v896_v48, %v897_v46 }
  0x15   : > { %v963_v52 = vsel %vm929_vm0, %v894_v45, %v895_v36  ;;  %v1076_v58 = vrot.slane %v2723_v26, 1  ;;  %v959_v60 = vsel %vm929_vm0, %v898_v51, %v899_v49  ;;  %v1077_v62 = vrot.slane %v2734_v32, 1 }
  0x16   : > { %v965_v57 = vsel %vm929_vm0, %v928_v50, %v893_v42  ;;  %v1040_v61 = vsel %vm2760_vm2, %v963_v52, 0.0  ;;  %v1078_v63 = vrot.slane %v2726_v27, 1  ;;  %v1079_v0 = vrot.slane %v2746_v38, 1  ;;  %2520 = vmatpush3.bf16.msra.mxu0 %v2517_v24  ;;  %2548 = vmatpush3.bf16.msra.mxu1 %v2517_v24 }
  0x17   : > { %v1038_v3 = vsel %vm2756_vm1, %v965_v57, 0.0  ;;  %v1042_v4 = vsel %vm2766_vm3, %v961_v56, 0.0  ;;  %v1143_v5 = vsel %vm1110_vm5, %v1076_v58, %v1077_v62  ;;  %v1145_v6 = vsel %vm1110_vm5, %v1074_v53, %v1075_v54  ;;  %2522 = vmatprep.subr.bf16.mxu0 %v2720_v25  ;;  %2541 = vmatprep.subr.bf16.mxu1 %v2720_v25 }
  0x18   : > { %v1141_v7 = vsel %vm1110_vm5, %v1078_v63, %v1079_v0  ;;  %v1259_v16 = vmul.f32 %v2835_v8, %v1038_v3  ;;  %v1261_v17 = vmul.f32 %v2835_v8, %v1040_v61  ;;  %v1263_v18 = vmul.f32 %v2835_v8, %v1042_v4 }
  0x19   : > { %v1295_v19 = vmul.f32 %v2838_v9, %v2740_v34  ;;  %v1299_v21 = vmul.f32 %v2838_v9, %v2726_v27  ;;  %v2865_v24 = vsel %vm2782_vm4, %v959_v60, 0.0  ;;  %v2871_v35 = vrot.slane %v2802_v59, %v1565_v14 }
  0x1a   : > { %2524 = vmatpush3.bf16.msra.mxu0 %v2720_v25  ;;  %v1329_v41 = vadd.f32 %v1297_v20, %v1261_v17  ;;  %v1363_v44 = vmul.f32 %v2857_v22, %v1145_v6  ;;  %v1365_v47 = vmul.f32 %v2857_v22, %v1143_v5  ;;  %v1142_v52 = vsel %vm1110_vm5, %v1077_v62, %v1078_v63 }
  0x1b   : > { %v1327_v28 = vadd.f32 %v1295_v19, %v1259_v16  ;;  %2526 = vmatprep.subr.bf16.mxu0 %v2729_v30  ;;  %v1331_v43 = vadd.f32 %v1299_v21, %v1263_v18  ;;  %v1367_v55 = vmul.f32 %v2857_v22, %v1141_v7  ;;  %v1431_v56 = vmul.f32 %v2860_v23, %v1040_v61  ;;  %v2892_v61 = vld [vmem:[%s3735_s2 + $0x8] ss:$0 sm:$0xff] }
  0x1c   : > { %v1433_v57 = vmul.f32 %v2860_v23, %v1042_v4  ;;  %2549 = vmatpush3.bf16.msra.mxu1 %v2720_v25  ;;  %v1397_v1 = vadd.f32 %v1365_v47, %v1329_v41  ;;  %v1499_v2 = vmul.f32 %v2868_v29, %v2723_v26  ;;  %v2885_v3 = vrot.slane %v2802_v59, %v1633_v15 }
  0x1d   : > { %v1395_v60 = vadd.f32 %v1363_v44, %v1327_v28  ;;  %2542 = vmatprep.subr.bf16.mxu1 %v2729_v30  ;;  %v1144_v25 = vsel %vm1110_vm5, %v1075_v54, %v1076_v58  ;;  %v1399_v62 = vadd.f32 %v1367_v55, %v1331_v43  ;;  %v1435_v63 = vmul.f32 %v2860_v23, %v2865_v24 }
  0x1e   : > { %2528 = vmatpush3.bf16.msra.mxu0 %v2729_v30  ;;  %v1501_v6 = vmul.f32 %v2868_v29, %v2726_v27  ;;  %v1465_v12 = vadd.f32 %v1433_v57, %v1397_v1  ;;  %v1567_v13 = vmul.f32 %v2871_v35, %v1143_v5  ;;  %v1701_v14 = vsub.s32 7, %v2677_v11 }
  0x1f   : > { %2530 = vmatprep.subr.bf16.mxu0 %v2731_v31  ;;  %v1463_v10 = vadd.f32 %v1431_v56, %v1395_v60  ;;  %v1569_v15 = vmul.f32 %v2871_v35, %v1141_v7  ;;  %v354_v16 = vadd.s32 8, %v2677_v11  ;;  %v356_v54 = vadd.s32 24, %v2677_v11 }
  0x20   : > { %v358_v58 = vadd.s32 40, %v2677_v11  ;;  %2550 = vmatpush3.bf16.msra.mxu1 %v2729_v30  ;;  %v1635_v18 = vmul.f32 %v2885_v3, %v1042_v4  ;;  %v2912_v19 = vrot.slane %v2802_v59, %v1701_v14  ;;  %v1771_v5 = vmul.f32 %v2892_v61, %v1141_v7 }
  0x21   : > { %v1531_v17 = vadd.f32 %v1499_v2, %v1463_v10  ;;  %2543 = vmatprep.subr.bf16.mxu1 %v2731_v31  ;;  %v1533_v20 = vadd.f32 %v1501_v6, %v1465_v12  ;;  %v400_v21 = vand.u32 15, %v354_v16  ;;  %v414_v28 = vand.u32 15, %v356_v54 }
  0x22   : > { %2532 = vmatpush3.bf16.msra.mxu0 %v2731_v31  ;;  %v428_v41 = vand.u32 15, %v358_v58  ;;  %v1703_v30 = vmul.f32 %v2912_v19, %v2726_v27  ;;  %v960_v59 = vsel %vm929_vm0, %v897_v46, %v898_v51  ;;  %v964_v4 = vsel %vm929_vm0, %v893_v42, %v894_v45 }
  0x23   : > { %2534 = vmatprep.subr.bf16.mxu0 %v2743_v37  ;;  %v1599_v43 = vadd.f32 %v1567_v13, %v1531_v17  ;;  %vm2932_vm6 = vcmp.lt.s32.totalorder %v400_v21, 15  ;;  %vm860_vm7 = vcmp.lt.s32.totalorder %v414_v28, 15  ;;  %v1080_v44 = vrot.slane %v2737_v33, 1 }
  0x24   : > { %vm862_vm8 = vcmp.lt.s32.totalorder %v428_v41, 15  ;;  %2551 = vmatpush3.bf16.msra.mxu1 %v2731_v31  ;;  %v962_v46 = vsel %vm929_vm0, %v895_v36, %v896_v48  ;;  %v1220_v42 = vsel %vm2932_vm6, %v1144_v25, 0.0  ;;  %v1260_v45 = vmul.f32 %v2835_v8, %v964_v4 }
  0x25   : > { %v1667_v27 = vadd.f32 %v1635_v18, %v1599_v43  ;;  %2544 = vmatprep.subr.bf16.mxu1 %v2743_v37  ;;  %v1140_v31 = vsel %vm1110_vm5, %v1079_v0, %v1080_v44  ;;  %v1222_v51 = vsel %vm860_vm7, %v1142_v52, 0.0  ;;  %v1264_v26 = vmul.f32 %v2835_v8, %v960_v59  ;;  %v2963_v0 = vld [vmem:[%s2711_s12 + $0x28] sm:$0xff] }
  0x26   : > { %2536 = vmatpush3.bf16.msra.mxu0 %v2743_v37  ;;  %v1296_v36 = vmul.f32 %v2838_v9, %v2749_v39  ;;  %v1224_v47 = vsel %vm862_vm8, %v1140_v31, 0.0  ;;  %v1300_v55 = vmul.f32 %v2838_v9, %v2746_v38  ;;  %v1364_v56 = vmul.f32 %v2857_v22, %v1220_v42 }
  0x27   : > { %v1735_v48 = vadd.f32 %v1703_v30, %v1667_v27  ;;  %v2959_v57 = vadd.f32 %v1435_v63, %v1399_v62  ;;  %v1601_v60 = vadd.f32 %v1569_v15, %v1533_v20  ;;  %v1432_v2 = vmul.f32 %v2860_v23, %v962_v46  ;;  %v2989_v20 = vld [vmem:[%s2711_s12 + $0x30] sm:$0xff] }
  0x28   : > { %v1328_v1 = vadd.f32 %v1296_v36, %v1260_v45  ;;  %2552 = vmatpush3.bf16.msra.mxu1 %v2743_v37  ;;  %v1262_v39 = vmul.f32 %v2835_v8, %v962_v46  ;;  %v1366_v25 = vmul.f32 %v2857_v22, %v1222_v51  ;;  %v1368_v6 = vmul.f32 %v2857_v22, %v1224_v47 }
  0x29   : > { %v1803_v52 = vadd.f32 %v1771_v5, %v1735_v48  ;;  %v1332_v10 = vadd.f32 %v1300_v55, %v1264_v26  ;;  %v1434_v62 = vmul.f32 %v2860_v23, %v960_v59  ;;  %v1500_v63 = vmul.f32 %v2868_v29, %v2734_v32 }
  0x2a   : > { %v1396_v12 = vadd.f32 %v1364_v56, %v1328_v1  ;;  %v1568_v13 = vmul.f32 %v2871_v35, %v1222_v51  ;;  %v2974_v37 = vmul.f32 %v2871_v35, %v1224_v47  ;;  %v1636_v14 = vmul.f32 %v2885_v3, %v960_v59 }
  0x2b   : > { %2457 = vmatprep.mubr.f32.mxu0 %v1803_v52  ;;  %v1081_v15 = vrot.slane %v2963_v0, 1  ;;  %v1265_v54 = vmul.f32 %v2835_v8, %v2865_v24  ;;  %v1301_v58 = vmul.f32 %v2838_v9, %v2737_v33  ;;  %v1637_v17 = vmul.f32 %v2885_v3, %v2865_v24  ;;  %v3017_v52 = vld [vmem:[%s2711_s12 + $0x38] sm:$0xff] }
  0x2c   : > { %v1464_v16 = vadd.f32 %v1432_v2, %v1396_v12  ;;  %v1705_v5 = vmul.f32 %v2912_v19, %v2737_v33  ;;  %v360_v21 = vadd.s32 56, %v2677_v11  ;;  %v900_v28 = vrot.slane %v2963_v0, 7 }
  0x2d   : > { %v1139_v18 = vsel %vm1110_vm5, %v1080_v44, %v1081_v15  ;;  %v2993_v41 = vadd.f32 %v1368_v6, %v1332_v10  ;;  %v1704_v30 = vmul.f32 %v2912_v19, %v2746_v38  ;;  %v1333_v59 = vadd.f32 %v1301_v58, %v1265_v54 }
  0x2e   : > { %v1532_v43 = vadd.f32 %v1500_v63, %v1464_v16  ;;  %v1369_v24 = vmul.f32 %v2857_v22, %v1139_v18  ;;  %v1669_v4 = vadd.f32 %v1637_v17, %v1601_v60  ;;  %v442_v7 = vand.u32 15, %v360_v21 }
  0x2f   : > { %v958_v44 = vsel %vm929_vm0, %v899_v49, %v900_v28  ;;  %v1773_v46 = vmul.f32 %v2892_v61, %v1139_v18  ;;  %v1082_v42 = vrot.slane %v2989_v20, 1  ;;  %v1298_v51 = vmul.f32 %v2838_v9, %v2734_v32 }
  0x30   : > { %v1600_v27 = vadd.f32 %v1568_v13, %v1532_v43  ;;  %v1266_v45 = vmul.f32 %v2835_v8, %v958_v44  ;;  %v1737_v31 = vadd.f32 %v1705_v5, %v1669_v4  ;;  %vm864_vm9 = vcmp.lt.s32.totalorder %v442_v7, 15 }
  0x31   : > { %v1302_v26 = vmul.f32 %v2838_v9, %v2963_v0  ;;  %v1772_v48 = vmul.f32 %v2892_v61, %v1224_v47  ;;  %v1571_v49 = vmul.f32 %v2871_v35, %v1139_v18  ;;  %v1138_v55 = vsel %vm1110_vm5, %v1081_v15, %v1082_v42 }
  0x32   : > { %v1668_v36 = vadd.f32 %v1636_v14, %v1600_v27  ;;  %v3013_v56 = vadd.f32 %v1369_v24, %v1333_v59  ;;  %v1226_v60 = vsel %vm864_vm9, %v1138_v55, 0.0  ;;  %v1330_v1 = vadd.f32 %v1298_v51, %v1262_v39 }
  0x33   : > { %v1436_v2 = vmul.f32 %v2860_v23, %v958_v44  ;;  %v1805_v6 = vadd.f32 %v1773_v46, %v1737_v31  ;;  %v1334_v10 = vadd.f32 %v1302_v26, %v1266_v45  ;;  %v1502_v12 = vmul.f32 %v2868_v29, %v2746_v38 }
  0x34   : > { %v1736_v32 = vadd.f32 %v1704_v30, %v1668_v36  ;;  %v1370_v47 = vmul.f32 %v2857_v22, %v1226_v60  ;;  %v1398_v63 = vadd.f32 %v1366_v25, %v1330_v1  ;;  %v1572_v13 = vmul.f32 %v2871_v35, %v1226_v60 }
  0x35   : > { %v361_v14 = vadd.s32 64, %v2677_v11  ;;  %v1638_v39 = vmul.f32 %v2885_v3, %v958_v44  ;;  %v901_v16 = vrot.slane %v2989_v20, 7  ;;  %v1083_v54 = vrot.slane %v3017_v52, 1 }
  0x36   : > { %v1804_v15 = vadd.f32 %v1772_v48, %v1736_v32  ;;  %v1466_v58 = vadd.f32 %v1434_v62, %v1398_v63  ;;  %v1706_v17 = vmul.f32 %v2912_v19, %v2963_v0  ;;  %v1503_v25 = vmul.f32 %v2868_v29, %v2737_v33  ;;  %v3041_v33 = vld [vmem:[%s2711_s12 + $0x40] sm:$0xff]  ;;  %v3067_v63 = vld [vmem:[%s2711_s12 + $0x48] sm:$0xff] }
  0x37   : > { %v449_v38 = vand.u32 15, %v361_v14  ;;  %v1774_v18 = vmul.f32 %v2892_v61, %v1226_v60  ;;  %v957_v5 = vsel %vm929_vm0, %v900_v28, %v901_v16  ;;  %v1137_v21 = vsel %vm1110_vm5, %v1082_v42, %v1083_v54 }
  0x38   : > { %2458 = vmatmul.mubr.f32.vlgmr.msra.gmra.mrb[0].mxu0 %v1804_v15  ;;  %v362_v43 = vadd.s32 72, %v2677_v11  ;;  %v1534_v62 = vadd.f32 %v1502_v12, %v1466_v58  ;;  %v1303_v30 = vmul.f32 %v2838_v9, %v2989_v20  ;;  %v1535_v59 = vadd.f32 %v1503_v25, %v2959_v57 }
  0x39   : > { %2460 = vmatprep.mubr.f32.mxu0 %v1805_v6  ;;  %vm829_vm10 = vcmp.gt.s32.totalorder %v449_v38, 0  ;;  %v3043_v24 = vadd.f32 %v1370_v47, %v1334_v10  ;;  %v1707_v28 = vmul.f32 %v2912_v19, %v2989_v20  ;;  %v1371_v46 = vmul.f32 %v2857_v22, %v1137_v21 }
  0x3a   : > { %v1046_v4 = vsel %vm829_vm10, %v957_v5, 0.0  ;;  %v456_v7 = vand.u32 15, %v362_v43  ;;  %v1602_v44 = vadd.f32 %v2974_v37, %v1534_v62  ;;  %v1603_v42 = vadd.f32 %v1571_v49, %v1535_v59 }
  0x3b   : > { %v1267_v27 = vmul.f32 %v2835_v8, %v1046_v4  ;;  %v1639_v45 = vmul.f32 %v2885_v3, %v1046_v4  ;;  %v902_v57 = vrot.slane %v3017_v52, 7  ;;  %v1084_v31 = vrot.slane %v3041_v33, 1 }
  0x3c   : > { %vm866_vm11 = vcmp.lt.s32.totalorder %v456_v7, 15  ;;  %v1670_v51 = vadd.f32 %v1638_v39, %v1602_v44  ;;  %v1775_v36 = vmul.f32 %v2892_v61, %v1137_v21  ;;  %v1468_v48 = vadd.f32 %v1436_v2, %v2993_v41  ;;  %v3089_v7 = vld [vmem:[%s2711_s12 + $0x50] sm:$0xff] }
  0x3d   : > { %v1335_v26 = vadd.f32 %v1303_v30, %v1267_v27  ;;  %v1671_v37 = vadd.f32 %v1639_v45, %v1603_v42  ;;  %v956_v55 = vsel %vm929_vm0, %v901_v16, %v902_v57  ;;  %v1136_v49 = vsel %vm1110_vm5, %v1083_v54, %v1084_v31 }
  0x3e   : > { %v1504_v60 = vmul.f32 %v2868_v29, %v2963_v0  ;;  %v1738_v1 = vadd.f32 %v1706_v17, %v1670_v51  ;;  %v1228_v32 = vsel %vm866_vm11, %v1136_v49, 0.0  ;;  %v1268_v6 = vmul.f32 %v2835_v8, %v956_v55 }
  0x3f   : > { %v1304_v10 = vmul.f32 %v2838_v9, %v3017_v52  ;;  %v1437_v12 = vmul.f32 %v2860_v23, %v1046_v4  ;;  %v1573_v41 = vmul.f32 %v2871_v35, %v1137_v21  ;;  %v1739_v2 = vadd.f32 %v1707_v28, %v1671_v37 }
  0x40   : > { %v1536_v47 = vadd.f32 %v1504_v60, %v1468_v48  ;;  %v1806_v14 = vadd.f32 %v1774_v18, %v1738_v1  ;;  %v3069_v15 = vadd.f32 %v1371_v46, %v1335_v26  ;;  %v1372_v0 = vmul.f32 %v2857_v22, %v1228_v32 }
  0x41   : > { %v1640_v39 = vmul.f32 %v2885_v3, %v956_v55  ;;  %v1807_v16 = vadd.f32 %v1775_v36, %v1739_v2  ;;  %v1438_v54 = vmul.f32 %v2860_v23, %v956_v55  ;;  %v1708_v17 = vmul.f32 %v2912_v19, %v3017_v52 }
  0x42   : > { %v1604_v58 = vadd.f32 %v1572_v13, %v1536_v47  ;;  %2461 = vmatmul.mubr.f32.gmra.mrb[2].mxu0 %v1806_v14  ;;  %v1336_v38 = vadd.f32 %v1304_v10, %v1268_v6  ;;  %v363_v25 = vadd.s32 80, %v2677_v11  ;;  %v903_v18 = vrot.slane %v3041_v33, 7 }
  0x43   : > { %v1085_v5 = vrot.slane %v3067_v63, 1  ;;  %2463 = vmatprep.mubr.f32.mxu0 %v1807_v16  ;;  %v1776_v43 = vmul.f32 %v2892_v61, %v1228_v32  ;;  %v1469_v62 = vadd.f32 %v1437_v12, %v3013_v56  ;;  %v1505_v13 = vmul.f32 %v2868_v29, %v2989_v20 }
  0x44   : > { %v1672_v21 = vadd.f32 %v1640_v39, %v1604_v58  ;;  %v1574_v30 = vmul.f32 %v2871_v35, %v1228_v32  ;;  %v463_v59 = vand.u32 15, %v363_v25  ;;  %v955_v4 = vsel %vm929_vm0, %v902_v57, %v903_v18 }
  0x45   : > { %v1135_v28 = vsel %vm1110_vm5, %v1084_v31, %v1085_v5  ;;  %v1305_v27 = vmul.f32 %v2838_v9, %v3041_v33  ;;  %v1537_v46 = vadd.f32 %v1505_v13, %v1469_v62  ;;  %v1709_v56 = vmul.f32 %v2912_v19, %v3041_v33 }
  0x46   : > { %v1740_v44 = vadd.f32 %v1708_v17, %v1672_v21  ;;  %vm831_vm12 = vcmp.gt.s32.totalorder %v463_v59, 0  ;;  %v1373_v20 = vmul.f32 %v2857_v22, %v1135_v28  ;;  %v364_v42 = vadd.s32 88, %v2677_v11 }
  0x47   : > { %v904_v45 = vrot.slane %v3067_v63, 7  ;;  %v1048_v51 = vsel %vm831_vm12, %v955_v4, 0.0  ;;  %v1605_v31 = vadd.f32 %v1573_v41, %v1537_v46  ;;  %v1086_v26 = vrot.slane %v3089_v7, 1 }
  0x48   : > { %v1808_v57 = vadd.f32 %v1776_v43, %v1740_v44  ;;  %v1269_v36 = vmul.f32 %v2835_v8, %v1048_v51  ;;  %v1641_v48 = vmul.f32 %v2885_v3, %v1048_v51  ;;  %v1777_v37 = vmul.f32 %v2892_v61, %v1135_v28 }
  0x49   : > { %v470_v55 = vand.u32 15, %v364_v42  ;;  %v954_v49 = vsel %vm929_vm0, %v903_v18, %v904_v45  ;;  %v1134_v60 = vsel %vm1110_vm5, %v1085_v5, %v1086_v26  ;;  %v1306_v1 = vmul.f32 %v2838_v9, %v3067_v63 }
  0x4a   : > { %2464 = vmatmul.mubr.f32.gmra.mrb[4].mxu0 %v1808_v57  ;;  %v1470_v32 = vadd.f32 %v1438_v54, %v3043_v24  ;;  %v1337_v6 = vadd.f32 %v1305_v27, %v1269_v36  ;;  %v1673_v10 = vadd.f32 %v1641_v48, %v1605_v31  ;;  %v1270_v12 = vmul.f32 %v2835_v8, %v954_v49  ;;  %v3117_v24 = vld [vmem:[%s2711_s12 + $0x58] sm:$0xff] }
  0x4b   : > { %vm868_vm13 = vcmp.lt.s32.totalorder %v470_v55, 15  ;;  %v1404_v41 = vadd.f32 %v1372_v0, %v1336_v38  ;;  %v1439_v2 = vmul.f32 %v2860_v23, %v1048_v51  ;;  %v1506_v14 = vmul.f32 %v2868_v29, %v3017_v52 }
  0x4c   : > { %v1230_v47 = vsel %vm868_vm13, %v1134_v60, 0.0  ;;  %v1575_v39 = vmul.f32 %v2871_v35, %v1135_v28  ;;  %v1741_v16 = vadd.f32 %v1709_v56, %v1673_v10  ;;  %v1440_v58 = vmul.f32 %v2860_v23, %v954_v49 }
  0x4d   : > { %v1642_v17 = vmul.f32 %v2885_v3, %v954_v49  ;;  %v3119_v54 = vadd.f32 %v1373_v20, %v1337_v6  ;;  %v1338_v25 = vadd.f32 %v1306_v1, %v1270_v12  ;;  %v1374_v0 = vmul.f32 %v2857_v22, %v1230_v47 }
  0x4e   : > { %v1538_v38 = vadd.f32 %v1506_v14, %v1470_v32  ;;  %v1809_v18 = vadd.f32 %v1777_v37, %v1741_v16  ;;  %v1576_v5 = vmul.f32 %v2871_v35, %v1230_v47  ;;  %v365_v52 = vadd.s32 96, %v2677_v11 }
  0x4f   : > { %v905_v21 = vrot.slane %v3089_v7, 7  ;;  %v1710_v62 = vmul.f32 %v2912_v19, %v3067_v63  ;;  %v1087_v13 = vrot.slane %v3117_v24, 1  ;;  %v1471_v59 = vadd.f32 %v1439_v2, %v3069_v15 }
  0x50   : > { %v1606_v43 = vadd.f32 %v1574_v30, %v1538_v38  ;;  %2466 = vmatprep.mubr.f32.mxu0 %v1809_v18  ;;  %v1778_v4 = vmul.f32 %v2892_v61, %v1230_v47  ;;  %v477_v28 = vand.u32 15, %v365_v52  ;;  %v1507_v27 = vmul.f32 %v2868_v29, %v3041_v33  ;;  %v3162_v52 = vld [vmem:[%s2711_s12 + $0x68] sm:$0xff] }
  0x51   : > { %v953_v44 = vsel %vm929_vm0, %v904_v45, %v905_v21  ;;  %v1133_v30 = vsel %vm1110_vm5, %v1086_v26, %v1087_v13  ;;  %v366_v56 = vadd.s32 104, %v2677_v11  ;;  %v906_v20 = vrot.slane %v3117_v24, 7  ;;  %v3143_v45 = vld [vmem:[%s2711_s12 + $0x60] sm:$0xff] }
  0x52   : > { %v1674_v46 = vadd.f32 %v1642_v17, %v1606_v43  ;;  %vm833_vm14 = vcmp.gt.s32.totalorder %v477_v28, 0  ;;  %v1307_v15 = vmul.f32 %v2838_v9, %v3089_v7  ;;  %v1539_v42 = vadd.f32 %v1507_v27, %v1471_v59 }
  0x53   : > { %v1711_v57 = vmul.f32 %v2912_v19, %v3089_v7  ;;  %v1050_v33 = vsel %vm833_vm14, %v953_v44, 0.0  ;;  %v1375_v31 = vmul.f32 %v2857_v22, %v1133_v30  ;;  %v484_v36 = vand.u32 15, %v366_v56 }
  0x54   : > { %v1742_v51 = vadd.f32 %v1710_v62, %v1674_v46  ;;  %v1271_v26 = vmul.f32 %v2835_v8, %v1050_v33  ;;  %v1607_v48 = vadd.f32 %v1575_v39, %v1539_v42  ;;  %v1643_v37 = vmul.f32 %v2885_v3, %v1050_v33 }
  0x55   : > { %v1779_v55 = vmul.f32 %v2892_v61, %v1133_v30  ;;  %vm870_vm15 = vcmp.lt.s32.totalorder %v484_v36, 15  ;;  %v952_v60 = vsel %vm929_vm0, %v905_v21, %v906_v20  ;;  %v1088_v1 = vrot.slane %v3143_v45, 1 }
  0x56   : > { %v1810_v49 = vadd.f32 %v1778_v4, %v1742_v51  ;;  %v1339_v32 = vadd.f32 %v1307_v15, %v1271_v26  ;;  %v1675_v6 = vadd.f32 %v1643_v37, %v1607_v48  ;;  %v1272_v10 = vmul.f32 %v2835_v8, %v952_v60 }
  0x57   : > { %v1308_v12 = vmul.f32 %v2838_v9, %v3117_v24  ;;  %v1406_v2 = vadd.f32 %v1374_v0, %v1338_v25  ;;  %v1132_v47 = vsel %vm1110_vm5, %v1087_v13, %v1088_v1  ;;  %v1472_v14 = vadd.f32 %v1440_v58, %v1404_v41 }
  0x58   : > { %2467 = vmatmul.mubr.f32.gmra.mrb[6].mxu0 %v1810_v49  ;;  %v1508_v39 = vmul.f32 %v2868_v29, %v3067_v63  ;;  %v1441_v16 = vmul.f32 %v2860_v23, %v1050_v33  ;;  %v1577_v17 = vmul.f32 %v2871_v35, %v1133_v30  ;;  %v1743_v38 = vadd.f32 %v1711_v57, %v1675_v6  ;;  %v3188_v33 = vld [vmem:[%s2711_s12 + $0x70] sm:$0xff] }
  0x59   : > { %v1232_v18 = vsel %vm870_vm15, %v1132_v47, 0.0  ;;  %v3164_v21 = vadd.f32 %v1375_v31, %v1339_v32  ;;  %v1442_v25 = vmul.f32 %v2860_v23, %v952_v60  ;;  %v1644_v43 = vmul.f32 %v2885_v3, %v952_v60 }
  0x5a   : > { %v1540_v0 = vadd.f32 %v1508_v39, %v1472_v14  ;;  %v1811_v62 = vadd.f32 %v1779_v55, %v1743_v38  ;;  %v1340_v41 = vadd.f32 %v1308_v12, %v1272_v10  ;;  %v1376_v58 = vmul.f32 %v2857_v22, %v1232_v18 }
  0x5b   : > { %v367_v63 = vadd.s32 112, %v2677_v11  ;;  %v1712_v59 = vmul.f32 %v2912_v19, %v3117_v24  ;;  %v907_v4 = vrot.slane %v3143_v45, 7  ;;  %v1089_v28 = vrot.slane %v3162_v52, 1 }
  0x5c   : > { %v1608_v13 = vadd.f32 %v1576_v5, %v1540_v0  ;;  %2469 = vmatprep.mubr.f32.mxu0 %v1811_v62  ;;  %v1578_v44 = vmul.f32 %v2871_v35, %v1232_v18  ;;  %v1473_v46 = vadd.f32 %v1441_v16, %v3119_v54  ;;  %v1509_v30 = vmul.f32 %v2868_v29, %v3089_v7 }
  0x5d   : > { %v491_v27 = vand.u32 15, %v367_v63  ;;  %v1780_v5 = vmul.f32 %v2892_v61, %v1232_v18  ;;  %v951_v15 = vsel %vm929_vm0, %v906_v20, %v907_v4  ;;  %v1131_v42 = vsel %vm1110_vm5, %v1088_v1, %v1089_v28  ;;  %v3211_v63 = vld [vmem:[%s2711_s12 + $0x78] sm:$0xff] }
  0x5e   : > { %v1676_v56 = vadd.f32 %v1644_v43, %v1608_v13  ;;  %v1309_v57 = vmul.f32 %v2838_v9, %v3143_v45  ;;  %v1541_v51 = vadd.f32 %v1509_v30, %v1473_v46  ;;  %v1713_v54 = vmul.f32 %v2912_v19, %v3143_v45 }
  0x5f   : > { %vm835_vm1 = vcmp.gt.s32.totalorder %v491_v27, 0  ;;  %v1377_v36 = vmul.f32 %v2857_v22, %v1131_v42  ;;  %v368_v26 = vadd.s32 120, %v2677_v11  ;;  %v1781_v55 = vmul.f32 %v2892_v61, %v1131_v42 }
  0x60   : > { %v1744_v7 = vadd.f32 %v1712_v59, %v1676_v56  ;;  %v1052_v31 = vsel %vm835_vm1, %v951_v15, 0.0  ;;  %v1609_v48 = vadd.f32 %v1577_v17, %v1541_v51  ;;  %v908_v1 = vrot.slane %v3162_v52, 7 }
  0x61   : > { %v1273_v20 = vmul.f32 %v2835_v8, %v1052_v31  ;;  %v1645_v37 = vmul.f32 %v2885_v3, %v1052_v31  ;;  %v498_v60 = vand.u32 15, %v368_v26  ;;  %v1090_v32 = vrot.slane %v3188_v33, 1  ;;  %v3235_v26 = vld [vmem:[%s2711_s12 + $0x80] sm:$0xff] }
  0x62   : > { %v1812_v49 = vadd.f32 %v1780_v5, %v1744_v7  ;;  %v1310_v12 = vmul.f32 %v2838_v9, %v3162_v52  ;;  %v1474_v47 = vadd.f32 %v1442_v25, %v1406_v2  ;;  %v950_v14 = vsel %vm929_vm0, %v907_v4, %v908_v1 }
  0x63   : > { %v1341_v6 = vadd.f32 %v1309_v57, %v1273_v20  ;;  %v1677_v10 = vadd.f32 %v1645_v37, %v1609_v48  ;;  %vm872_vm2 = vcmp.lt.s32.totalorder %v498_v60, 15  ;;  %v1130_v39 = vsel %vm1110_vm5, %v1089_v28, %v1090_v32 }
  0x64   : > { %2470 = vmatmul.mubr.f32.gmra.mrb[8].mxu0 %v1812_v49  ;;  %v1510_v16 = vmul.f32 %v2868_v29, %v3117_v24  ;;  %v1443_v17 = vmul.f32 %v2860_v23, %v1052_v31  ;;  %v1234_v18 = vsel %vm872_vm2, %v1130_v39, 0.0  ;;  %v1274_v0 = vmul.f32 %v2835_v8, %v950_v14 }
  0x65   : > { %v1745_v38 = vadd.f32 %v1713_v54, %v1677_v10  ;;  %v1408_v43 = vadd.f32 %v1376_v58, %v1340_v41  ;;  %v3207_v62 = vadd.f32 %v1377_v36, %v1341_v6  ;;  %v1579_v2 = vmul.f32 %v2871_v35, %v1131_v42 }
  0x66   : > { %v1542_v25 = vadd.f32 %v1510_v16, %v1474_v47  ;;  %v1342_v59 = vadd.f32 %v1310_v12, %v1274_v0  ;;  %v1378_v4 = vmul.f32 %v2857_v22, %v1234_v18  ;;  %v1646_v24 = vmul.f32 %v2885_v3, %v950_v14 }
  0x67   : > { %v1813_v13 = vadd.f32 %v1781_v55, %v1745_v38  ;;  %v1714_v27 = vmul.f32 %v2912_v19, %v3162_v52  ;;  %v369_v46 = vadd.s32 128, %v2677_v11  ;;  %v909_v41 = vrot.slane %v3188_v33, 7 }
  0x68   : > { %v1610_v28 = vadd.f32 %v1578_v44, %v1542_v25  ;;  %v1444_v58 = vmul.f32 %v2860_v23, %v950_v14  ;;  %v1091_v30 = vrot.slane %v3211_v63, 1  ;;  %v1475_v56 = vadd.f32 %v1443_v17, %v3164_v21 }
  0x69   : > { %2472 = vmatprep.mubr.f32.mxu0 %v1813_v13  ;;  %v1511_v5 = vmul.f32 %v2868_v29, %v3143_v45  ;;  %v1782_v44 = vmul.f32 %v2892_v61, %v1234_v18  ;;  %v505_v42 = vand.u32 15, %v369_v46  ;;  %v949_v57 = vsel %vm929_vm0, %v908_v1, %v909_v41 }
  0x6a   : > { %v1678_v15 = vadd.f32 %v1646_v24, %v1610_v28  ;;  %v1129_v51 = vsel %vm1110_vm5, %v1090_v32, %v1091_v30  ;;  %v370_v7 = vadd.s32 136, %v2677_v11  ;;  %v910_v31 = vrot.slane %v3211_v63, 7 }
  0x6b   : > { %v1543_v54 = vadd.f32 %v1511_v5, %v1475_v56  ;;  %v3231_v36 = vadd.f32 %v1378_v4, %v1342_v59  ;;  %v1580_v21 = vmul.f32 %v2871_v35, %v1234_v18  ;;  %vm837_vm3 = vcmp.gt.s32.totalorder %v505_v42, 0 }
  0x6c   : > { %v1746_v45 = vadd.f32 %v1714_v27, %v1678_v15  ;;  %v1054_v20 = vsel %vm837_vm3, %v949_v57, 0.0  ;;  %v1715_v37 = vmul.f32 %v2912_v19, %v3188_v33  ;;  %v512_v55 = vand.u32 15, %v370_v7 }
  0x6d   : > { %v1611_v48 = vadd.f32 %v1579_v2, %v1543_v54  ;;  %v3240_v60 = vmul.f32 %v2857_v22, %v1129_v51  ;;  %v1581_v1 = vmul.f32 %v2871_v35, %v1129_v51  ;;  %v1647_v32 = vmul.f32 %v2885_v3, %v1054_v20  ;;  %v3260_v2 = vld [vmem:[%s2711_s12 + $0x88] sm:$0xff] }
  0x6e   : > { %v1814_v49 = vadd.f32 %v1782_v44, %v1746_v45  ;;  %vm874_vm4 = vcmp.lt.s32.totalorder %v512_v55, 15  ;;  %v948_v6 = vsel %vm929_vm0, %v909_v41, %v910_v31  ;;  %v1092_v10 = vrot.slane %v3235_v26, 1 }
  0x6f   : > { %v1312_v12 = vmul.f32 %v2838_v9, %v3211_v63  ;;  %v1679_v47 = vadd.f32 %v1647_v32, %v1611_v48  ;;  %v1783_v14 = vmul.f32 %v2892_v61, %v1129_v51  ;;  %v1276_v39 = vmul.f32 %v2835_v8, %v948_v6  ;;  %v3282_v51 = vld [vmem:[%s2711_s12 + $0x90] sm:$0xff] }
  0x70   : > { %2473 = vmatmul.mubr.f32.gmra.mrb[10].mxu0 %v1814_v49  ;;  %v1476_v16 = vadd.f32 %v1444_v58, %v1408_v43  ;;  %v3252_v17 = vmul.f32 %v2835_v8, %v1054_v20  ;;  %v1445_v38 = vmul.f32 %v2860_v23, %v1054_v20  ;;  %v1128_v18 = vsel %vm1110_vm5, %v1091_v30, %v1092_v10 }
  0x71   : > { %v1512_v0 = vmul.f32 %v2868_v29, %v3162_v52  ;;  %v1747_v25 = vadd.f32 %v1715_v37, %v1679_v47  ;;  %v1236_v13 = vsel %vm874_vm4, %v1128_v18, 0.0  ;;  %v1446_v59 = vmul.f32 %v2860_v23, %v948_v6 }
  0x72   : > { %v371_v4 = vadd.s32 144, %v2677_v11  ;;  %v1344_v43 = vadd.f32 %v1312_v12, %v1276_v39  ;;  %v1648_v28 = vmul.f32 %v2885_v3, %v948_v6  ;;  %v1716_v27 = vmul.f32 %v2912_v19, %v3211_v63 }
  0x73   : > { %v1544_v24 = vadd.f32 %v1512_v0, %v1476_v16  ;;  %v1815_v46 = vadd.f32 %v1783_v14, %v1747_v25  ;;  %v911_v52 = vrot.slane %v3235_v26, 7  ;;  %v1093_v58 = vrot.slane %v3260_v2, 1 }
  0x74   : > { %v519_v41 = vand.u32 15, %v371_v4  ;;  %v1380_v30 = vmul.f32 %v2857_v22, %v1236_v13  ;;  %v1313_v5 = vmul.f32 %v2838_v9, %v3235_v26  ;;  %v1477_v15 = vadd.f32 %v1445_v38, %v3207_v62 }
  0x75   : > { %v1612_v56 = vadd.f32 %v1580_v21, %v1544_v24  ;;  %2475 = vmatprep.mubr.f32.mxu0 %v1815_v46  ;;  %v947_v44 = vsel %vm929_vm0, %v910_v31, %v911_v52  ;;  %v3277_v42 = vsel %vm1110_vm5, %v1092_v10, %v1093_v58  ;;  %v1513_v57 = vmul.f32 %v2868_v29, %v3188_v33  ;;  %v3315_v46 = vld [vmem:[%s2711_s12 + $0x98] sm:$0xff] }
  0x76   : > { %vm839_vm6 = vcmp.gt.s32.totalorder %v519_v41, 0  ;;  %v1784_v7 = vmul.f32 %v2892_v61, %v1236_v13  ;;  %v1381_v62 = vmul.f32 %v2857_v22, %v3277_v42  ;;  %v1717_v48 = vmul.f32 %v2912_v19, %v3235_v26 }
  0x77   : > { %v1680_v54 = vadd.f32 %v1648_v28, %v1612_v56  ;;  %v3285_v21 = vsel %vm839_vm6, %v947_v44, 0.0  ;;  %v1545_v45 = vadd.f32 %v1513_v57, %v1477_v15  ;;  %v372_v55 = vadd.s32 152, %v2677_v11 }
  0x78   : > { %v1277_v31 = vmul.f32 %v2835_v8, %v3285_v21  ;;  %v1649_v20 = vmul.f32 %v2885_v3, %v3285_v21  ;;  %v912_v49 = vrot.slane %v3260_v2, 7  ;;  %v1094_v32 = vrot.slane %v3282_v51, 1 }
  0x79   : > { %v1748_v37 = vadd.f32 %v1716_v27, %v1680_v54  ;;  %v1613_v10 = vadd.f32 %v1581_v1, %v1545_v45  ;;  %v1314_v12 = vmul.f32 %v2838_v9, %v3260_v2  ;;  %v1478_v47 = vadd.f32 %v1446_v59, %v3231_v36 }
  0x7a   : > { %v1345_v6 = vadd.f32 %v1313_v5, %v1277_v31  ;;  %v526_v39 = vand.u32 15, %v372_v55  ;;  %v946_v16 = vsel %vm929_vm0, %v911_v52, %v912_v49  ;;  %v1126_v38 = vsel %vm1110_vm5, %v1093_v58, %v1094_v32 }
  0x7b   : > { %v1816_v14 = vadd.f32 %v1784_v7, %v1748_v37  ;;  %v1582_v18 = vmul.f32 %v2871_v35, %v1236_v13  ;;  %v1681_v0 = vadd.f32 %v1649_v20, %v1613_v10  ;;  %v1785_v1 = vmul.f32 %v2892_v61, %v3277_v42  ;;  %v3318_v13 = vld [vmem:[%s2711_s12 + $0xa0] sm:$0xff] }
  0x7c   : > { %v1278_v25 = vmul.f32 %v2835_v8, %v946_v16  ;;  %v3309_v4 = vadd.f32 %v1380_v30, %v1344_v43  ;;  %v1413_v36 = vadd.f32 %v1381_v62, %v1345_v6  ;;  %vm876_vm7 = vcmp.lt.s32.totalorder %v526_v39, 15 }
  0x7d   : > { %2476 = vmatmul.mubr.f32.gmra.mrb[12].mxu0 %v1816_v14  ;;  %v1514_v59 = vmul.f32 %v2868_v29, %v3211_v63  ;;  %v1749_v24 = vadd.f32 %v1717_v48, %v1681_v0  ;;  %v1238_v28 = vsel %vm876_vm7, %v1126_v38, 0.0  ;;  %v1650_v27 = vmul.f32 %v2885_v3, %v946_v16 }
  0x7e   : > { %v373_v41 = vadd.s32 160, %v2677_v11  ;;  %v1346_v52 = vadd.f32 %v1314_v12, %v1278_v25  ;;  %v1382_v43 = vmul.f32 %v2857_v22, %v1238_v28  ;;  %v1718_v30 = vmul.f32 %v2912_v19, %v3260_v2 }
  0x7f   : > { %v1546_v58 = vadd.f32 %v1514_v59, %v1478_v47  ;;  %v1817_v56 = vadd.f32 %v1785_v1, %v1749_v24  ;;  %v375_v63 = vadd.s32 176, %v2677_v11  ;;  %v913_v15 = vrot.slane %v3282_v51, 7 }
  0x80   : > { %v533_v5 = vand.u32 15, %v373_v41  ;;  %v1786_v57 = vmul.f32 %v2892_v61, %v1238_v28  ;;  %v914_v54 = vrot.slane %v3315_v46, 7  ;;  %v915_v7 = vrot.slane %v3318_v13, 7 }
  0x81   : > { %v1614_v44 = vadd.f32 %v1582_v18, %v1546_v58  ;;  %2478 = vmatprep.mubr.f32.mxu0 %v1817_v56  ;;  %v547_v62 = vand.u32 15, %v375_v63  ;;  %v945_v31 = vsel %vm929_vm0, %v912_v49, %v913_v15  ;;  %v1095_v45 = vrot.slane %v3315_v46, 1 }
  0x82   : > { %vm841_vm8 = vcmp.gt.s32.totalorder %v533_v5, 0  ;;  %v943_v48 = vsel %vm929_vm0, %v914_v54, %v915_v7  ;;  %v1311_v55 = vmul.f32 %v2838_v9, %v3188_v33  ;;  %v1315_v49 = vmul.f32 %v2838_v9, %v3282_v51  ;;  %v3368_v5 = vld [vmem:[%s2711_s12 + $0xa8] sm:$0xff] }
  0x83   : > { %v1682_v20 = vadd.f32 %v1650_v27, %v1614_v44  ;;  %v1058_v37 = vsel %vm841_vm8, %v945_v31, 0.0  ;;  %vm843_vm9 = vcmp.gt.s32.totalorder %v547_v62, 0  ;;  %v1125_v6 = vsel %vm1110_vm5, %v1094_v32, %v1095_v45 }
  0x84   : > { %v1279_v10 = vmul.f32 %v2835_v8, %v1058_v37  ;;  %v1060_v47 = vsel %vm843_vm9, %v943_v48, 0.0  ;;  %v1343_v14 = vadd.f32 %v1311_v55, %v3252_v17  ;;  %v1383_v39 = vmul.f32 %v2857_v22, %v1125_v6 }
  0x85   : > { %v1750_v12 = vadd.f32 %v1718_v30, %v1682_v20  ;;  %v1448_v38 = vmul.f32 %v2860_v23, %v946_v16  ;;  %v1447_v33 = vmul.f32 %v2860_v23, %v3285_v21  ;;  %v1449_v0 = vmul.f32 %v2860_v23, %v1058_v37 }
  0x86   : > { %v1347_v18 = vadd.f32 %v1315_v49, %v1279_v10  ;;  %v1411_v1 = vadd.f32 %v3240_v60, %v1343_v14  ;;  %v1515_v25 = vmul.f32 %v2868_v29, %v3235_v26  ;;  %v1517_v59 = vmul.f32 %v2868_v29, %v3282_v51 }
  0x87   : > { %v1818_v32 = vadd.f32 %v1786_v57, %v1750_v12  ;;  %v1414_v17 = vadd.f32 %v1382_v43, %v1346_v52  ;;  %v1584_v24 = vmul.f32 %v2871_v35, %v1238_v28  ;;  %v1451_v16 = vmul.f32 %v2860_v23, %v1060_v47 }
  0x88   : > { %v1481_v27 = vadd.f32 %v1449_v0, %v1413_v36  ;;  %v1415_v21 = vadd.f32 %v1383_v39, %v1347_v18  ;;  %v1479_v41 = vadd.f32 %v1447_v33, %v1411_v1  ;;  %v1583_v58 = vmul.f32 %v2871_v35, %v3277_v42  ;;  %v3392_v33 = vld [vmem:[%s2711_s12 + $0xb0] sm:$0xff] }
  0x89   : > { %2479 = vmatmul.mubr.f32.gmra.mrb[14].mxu0 %v1818_v32  ;;  %v1585_v60 = vmul.f32 %v2871_v35, %v1125_v6  ;;  %v1651_v26 = vmul.f32 %v2885_v3, %v1058_v37  ;;  %v374_v56 = vadd.s32 168, %v2677_v11  ;;  %v944_v28 = vsel %vm929_vm0, %v913_v15, %v914_v54 }
  0x8a   : > { %v1549_v30 = vadd.f32 %v1517_v59, %v1481_v27  ;;  %v1547_v52 = vadd.f32 %v1515_v25, %v1479_v41  ;;  %v1719_v36 = vmul.f32 %v2912_v19, %v3282_v51  ;;  %v1787_v43 = vmul.f32 %v2892_v61, %v1125_v6 }
  0x8b   : > { %v1096_v63 = vrot.slane %v3318_v13, 1  ;;  %v540_v42 = vand.u32 15, %v374_v56  ;;  %v1280_v44 = vmul.f32 %v2835_v8, %v944_v28  ;;  %v1316_v57 = vmul.f32 %v2838_v9, %v3315_v46 }
  0x8c   : > { %v1480_v62 = vadd.f32 %v1448_v38, %v3309_v4  ;;  %v3374_v31 = vadd.f32 %v1451_v16, %v1415_v21  ;;  %v1615_v15 = vadd.f32 %v1583_v58, %v1547_v52  ;;  %v1516_v54 = vmul.f32 %v2868_v29, %v3260_v2 }
  0x8d   : > { %v1124_v51 = vsel %vm1110_vm5, %v1095_v45, %v1096_v63  ;;  %v1617_v20 = vadd.f32 %v1585_v60, %v1549_v30  ;;  %vm878_vm10 = vcmp.lt.s32.totalorder %v540_v42, 15  ;;  %v1652_v48 = vmul.f32 %v2885_v3, %v944_v28 }
  0x8e   : > { %v1097_v37 = vrot.slane %v3368_v5, 1  ;;  %v1683_v55 = vadd.f32 %v1651_v26, %v1615_v15  ;;  %v1240_v6 = vsel %vm878_vm10, %v1124_v51, 0.0  ;;  %v1548_v10 = vadd.f32 %v1516_v54, %v1480_v62  ;;  %v3424_v51 = vld [vmem:[%s2711_s12 + $0xb8] sm:$0xff] }
  0x8f   : > { %v1281_v4 = vmul.f32 %v2835_v8, %v1060_v47  ;;  %v1348_v49 = vadd.f32 %v1316_v57, %v1280_v44  ;;  %v1450_v12 = vmul.f32 %v2860_v23, %v944_v28  ;;  %v1720_v45 = vmul.f32 %v2912_v19, %v3315_v46 }
  0x90   : > { %v1123_v2 = vsel %vm1110_vm5, %v1096_v63, %v1097_v37  ;;  %v1751_v14 = vadd.f32 %v1719_v36, %v1683_v55  ;;  %v1384_v39 = vmul.f32 %v2857_v22, %v1240_v6  ;;  %v1616_v38 = vadd.f32 %v1584_v24, %v1548_v10  ;;  %v3402_v24 = vld [vmem:[%s3735_s2 + $0x8] ss:$0 sm:$0xff] }
  0x91   : > { %v1317_v18 = vmul.f32 %v2838_v9, %v3318_v13  ;;  %v1788_v0 = vmul.f32 %v2892_v61, %v1240_v6  ;;  %v1385_v32 = vmul.f32 %v2857_v22, %v1123_v2  ;;  %v1653_v1 = vmul.f32 %v2885_v3, %v1060_v47 }
  0x92   : > { %v1721_v25 = vmul.f32 %v2912_v19, %v3318_v13  ;;  %v1819_v59 = vadd.f32 %v1787_v43, %v1751_v14  ;;  %v1684_v16 = vadd.f32 %v1652_v48, %v1616_v38  ;;  %v1789_v21 = vmul.f32 %v3402_v24, %v1123_v2 }
  0x93   : > { %v1349_v27 = vadd.f32 %v1317_v18, %v1281_v4  ;;  %v1685_v41 = vadd.f32 %v1653_v1, %v1617_v20  ;;  %v376_v61 = vadd.s32 184, %v2677_v11  ;;  %v916_v58 = vrot.slane %v3368_v5, 7 }
  0x94   : > { %v1098_v47 = vrot.slane %v3392_v33, 1  ;;  %2481 = vmatprep.mubr.f32.mxu1 %v1819_v59  ;;  %v1586_v60 = vmul.f32 %v2871_v35, %v1240_v6  ;;  %v1752_v30 = vadd.f32 %v1720_v45, %v1684_v16  ;;  %v1318_v26 = vmul.f32 %v2838_v9, %v3368_v5  ;;  %v3449_v16 = vld [vmem:[%s2711_s12 + $0xc0] sm:$0xff] }
  0x95   : > { %v1482_v56 = vadd.f32 %v1450_v12, %v1414_v17  ;;  %v1753_v28 = vadd.f32 %v1721_v25, %v1685_v41  ;;  %v554_v52 = vand.u32 15, %v376_v61  ;;  %v942_v36 = vsel %vm929_vm0, %v915_v7, %v916_v58 }
  0x96   : > { %v1122_v43 = vsel %vm1110_vm5, %v1097_v37, %v1098_v47  ;;  %v1416_v63 = vadd.f32 %v1384_v39, %v1348_v49  ;;  %v1820_v42 = vadd.f32 %v1788_v0, %v1752_v30  ;;  %v1282_v44 = vmul.f32 %v2835_v8, %v942_v36 }
  0x97   : > { %v1518_v57 = vmul.f32 %v2868_v29, %v3315_v46  ;;  %v3420_v62 = vadd.f32 %v1385_v32, %v1349_v27  ;;  %v1587_v17 = vmul.f32 %v2871_v35, %v1123_v2  ;;  %v1821_v15 = vadd.f32 %v1789_v21, %v1753_v28 }
  0x98   : > { %vm880_vm11 = vcmp.lt.s32.totalorder %v554_v52, 15  ;;  %2482 = vmatmul.mubr.f32.vlgmr.msra.gmra.mrb[0].mxu1 %v1820_v42  ;;  %v1654_v20 = vmul.f32 %v2885_v3, %v942_v36  ;;  %v377_v48 = vadd.s32 192, %v2677_v11  ;;  %v1350_v37 = vadd.f32 %v1318_v26, %v1282_v44 }
  0x99   : > { %v1242_v7 = vsel %vm880_vm11, %v1122_v43, 0.0  ;;  %v1550_v54 = vadd.f32 %v1518_v57, %v1482_v56  ;;  %2484 = vmatprep.mubr.f32.mxu1 %v1821_v15  ;;  %v1452_v55 = vmul.f32 %v2860_v23, %v942_v36  ;;  %v1722_v46 = vmul.f32 %v2912_v19, %v3368_v5 }
  0x9a   : > { %v917_v6 = vrot.slane %v3392_v33, 7  ;;  %v1386_v10 = vmul.f32 %v2857_v22, %v1242_v7  ;;  %v561_v49 = vand.u32 15, %v377_v48  ;;  %v1099_v12 = vrot.slane %v3424_v51, 1 }
  0x9b   : > { %v1618_v4 = vadd.f32 %v1586_v60, %v1550_v54  ;;  %v1790_v45 = vmul.f32 %v3402_v24, %v1242_v7  ;;  %v1319_v14 = vmul.f32 %v2838_v9, %v3392_v33  ;;  %v1519_v39 = vmul.f32 %v2868_v29, %v3318_v13 }
  0x9c   : > { %v941_v2 = vsel %vm929_vm0, %v916_v58, %v917_v6  ;;  %vm845_vm12 = vcmp.gt.s32.totalorder %v561_v49, 0  ;;  %v1121_v18 = vsel %vm1110_vm5, %v1098_v47, %v1099_v12  ;;  %v378_v0 = vadd.s32 200, %v2677_v11 }
  0x9d   : > { %v1686_v38 = vadd.f32 %v1654_v20, %v1618_v4  ;;  %v1588_v32 = vmul.f32 %v2871_v35, %v1242_v7  ;;  %v1062_v1 = vsel %vm845_vm12, %v941_v2, 0.0  ;;  %v1551_v25 = vadd.f32 %v1519_v39, %v3374_v31  ;;  %v3469_v20 = vld [vmem:[%s2711_s12 + $0xc8] sm:$0xff] }
  0x9e   : > { %v1723_v59 = vmul.f32 %v2912_v19, %v3392_v33  ;;  %v1283_v13 = vmul.f32 %v2835_v8, %v1062_v1  ;;  %v1387_v21 = vmul.f32 %v2857_v22, %v1121_v18  ;;  %v1655_v41 = vmul.f32 %v2885_v3, %v1062_v1 }
  0x9f   : > { %v1754_v27 = vadd.f32 %v1722_v46, %v1686_v38  ;;  %v1619_v61 = vadd.f32 %v1587_v17, %v1551_v25  ;;  %v1791_v58 = vmul.f32 %v3402_v24, %v1121_v18  ;;  %v568_v47 = vand.u32 15, %v378_v0 }
  0xa0   : > { %v918_v60 = vrot.slane %v3424_v51, 7  ;;  %v1351_v31 = vadd.f32 %v1319_v14, %v1283_v13  ;;  %v1100_v26 = vrot.slane %v3449_v16, 1  ;;  %v1320_v56 = vmul.f32 %v2838_v9, %v3424_v51 }
  0xa1   : > { %v1822_v30 = vadd.f32 %v1790_v45, %v1754_v27  ;;  %v1687_v28 = vadd.f32 %v1655_v41, %v1619_v61  ;;  %vm882_vm13 = vcmp.lt.s32.totalorder %v568_v47, 15  ;;  %v1484_v36 = vadd.f32 %v1452_v55, %v1416_v63 }
  0xa2   : > { %v940_v52 = vsel %vm929_vm0, %v917_v6, %v918_v60  ;;  %v1418_v43 = vadd.f32 %v1386_v10, %v1350_v37  ;;  %v1589_v42 = vmul.f32 %v2871_v35, %v1121_v18  ;;  %v1120_v44 = vsel %vm1110_vm5, %v1099_v12, %v1100_v26 }
  0xa3   : > { %2485 = vmatmul.mubr.f32.gmra.mrb[2].mxu1 %v1822_v30  ;;  %v1284_v57 = vmul.f32 %v2835_v8, %v940_v52  ;;  %v1453_v17 = vmul.f32 %v2860_v23, %v1062_v1  ;;  %v1755_v15 = vadd.f32 %v1723_v59, %v1687_v28  ;;  %v1244_v7 = vsel %vm882_vm13, %v1120_v44, 0.0 }
  0xa4   : > { %v1520_v54 = vmul.f32 %v2868_v29, %v3368_v5  ;;  %v3471_v48 = vadd.f32 %v1387_v21, %v1351_v31  ;;  %v1454_v37 = vmul.f32 %v2860_v23, %v940_v52  ;;  %v1656_v55 = vmul.f32 %v2885_v3, %v940_v52 }
  0xa5   : > { %v1352_v63 = vadd.f32 %v1320_v56, %v1284_v57  ;;  %v1823_v46 = vadd.f32 %v1791_v58, %v1755_v15  ;;  %v1388_v6 = vmul.f32 %v2857_v22, %v1244_v7  ;;  %v379_v4 = vadd.s32 208, %v2677_v11 }
  0xa6   : > { %v1552_v10 = vadd.f32 %v1520_v54, %v1484_v36  ;;  %v1590_v49 = vmul.f32 %v2871_v35, %v1244_v7  ;;  %v1724_v5 = vmul.f32 %v2912_v19, %v3424_v51  ;;  %v919_v12 = vrot.slane %v3449_v16, 7 }
  0xa7   : > { %v1101_v45 = vrot.slane %v3469_v20, 1  ;;  %2487 = vmatprep.mubr.f32.mxu1 %v1823_v46  ;;  %v575_v14 = vand.u32 15, %v379_v4  ;;  %v1485_v39 = vadd.f32 %v1453_v17, %v3420_v62  ;;  %v1521_v38 = vmul.f32 %v2868_v29, %v3392_v33  ;;  %v3494_v62 = vld [vmem:[%s2711_s12 + $0xd0] sm:$0xff] }
  0xa8   : > { %v1620_v2 = vadd.f32 %v1588_v32, %v1552_v10  ;;  %v1792_v18 = vmul.f32 %v3402_v24, %v1244_v7  ;;  %v939_v0 = vsel %vm929_vm0, %v918_v60, %v919_v12  ;;  %v380_v25 = vadd.s32 216, %v2677_v11 }
  0xa9   : > { %v1119_v1 = vsel %vm1110_vm5, %v1100_v26, %v1101_v45  ;;  %vm847_vm14 = vcmp.gt.s32.totalorder %v575_v14, 0  ;;  %v1321_v32 = vmul.f32 %v2838_v9, %v3449_v16  ;;  %v1553_v27 = vadd.f32 %v1521_v38, %v1485_v39 }
  0xaa   : > { %v1688_v59 = vadd.f32 %v1656_v55, %v1620_v2  ;;  %v3496_v13 = vadd.f32 %v1388_v6, %v1352_v63  ;;  %v1064_v33 = vsel %vm847_vm14, %v939_v0, 0.0  ;;  %v1725_v21 = vmul.f32 %v2912_v19, %v3449_v16  ;;  %v3520_v6 = vld [vmem:[%s2711_s12 + $0xd8] sm:$0xff] }
  0xab   : > { %v582_v41 = vand.u32 15, %v380_v25  ;;  %v1285_v58 = vmul.f32 %v2835_v8, %v1064_v33  ;;  %v1389_v47 = vmul.f32 %v2857_v22, %v1119_v1  ;;  %v1621_v60 = vadd.f32 %v1589_v42, %v1553_v27 }
  0xac   : > { %v1756_v61 = vadd.f32 %v1724_v5, %v1688_v59  ;;  %v1657_v30 = vmul.f32 %v2885_v3, %v1064_v33  ;;  %v920_v31 = vrot.slane %v3469_v20, 7  ;;  %v1102_v26 = vrot.slane %v3494_v62, 1 }
  0xad   : > { %vm884_vm15 = vcmp.lt.s32.totalorder %v582_v41, 15  ;;  %v1353_v28 = vadd.f32 %v1321_v32, %v1285_v58  ;;  %v1793_v52 = vmul.f32 %v3402_v24, %v1119_v1  ;;  %v1486_v36 = vadd.f32 %v1454_v37, %v1418_v43  ;;  %v3544_v58 = vld [vmem:[%s2711_s12 + $0xe0] sm:$0xff] }
  0xae   : > { %v1824_v56 = vadd.f32 %v1792_v18, %v1756_v61  ;;  %v1689_v44 = vadd.f32 %v1657_v30, %v1621_v60  ;;  %v938_v57 = vsel %vm929_vm0, %v919_v12, %v920_v31  ;;  %v1118_v42 = vsel %vm1110_vm5, %v1101_v45, %v1102_v26 }
  0xaf   : > { %v1522_v17 = vmul.f32 %v2868_v29, %v3424_v51  ;;  %v1455_v15 = vmul.f32 %v2860_v23, %v1064_v33  ;;  %v1246_v7 = vsel %vm884_vm15, %v1118_v42, 0.0  ;;  %v1286_v54 = vmul.f32 %v2835_v8, %v938_v57 }
  0xb0   : > { %2488 = vmatmul.mubr.f32.gmra.mrb[4].mxu1 %v1824_v56  ;;  %v1322_v63 = vmul.f32 %v2838_v9, %v3469_v20  ;;  %v3516_v43 = vadd.f32 %v1389_v47, %v1353_v28  ;;  %v1591_v37 = vmul.f32 %v2871_v35, %v1119_v1  ;;  %v1757_v55 = vadd.f32 %v1725_v21, %v1689_v44 }
  0xb1   : > { %v1554_v46 = vadd.f32 %v1522_v17, %v1486_v36  ;;  %v1390_v10 = vmul.f32 %v2857_v22, %v1246_v7  ;;  %v1456_v51 = vmul.f32 %v2860_v23, %v938_v57  ;;  %v1658_v4 = vmul.f32 %v2885_v3, %v938_v57 }
  0xb2   : > { %v1726_v5 = vmul.f32 %v2912_v19, %v3469_v20  ;;  %v1825_v12 = vadd.f32 %v1793_v52, %v1757_v55  ;;  %v381_v2 = vadd.s32 224, %v2677_v11  ;;  %v921_v14 = vrot.slane %v3494_v62, 7 }
  0xb3   : > { %v1622_v45 = vadd.f32 %v1590_v49, %v1554_v46  ;;  %v1354_v39 = vadd.f32 %v1322_v63, %v1286_v54  ;;  %v1794_v38 = vmul.f32 %v3402_v24, %v1246_v7  ;;  %v1103_v18 = vrot.slane %v3520_v6, 1 }
  0xb4   : > { %v1487_v0 = vadd.f32 %v1455_v15, %v3471_v48  ;;  %2490 = vmatprep.mubr.f32.mxu1 %v1825_v12  ;;  %v589_v25 = vand.u32 15, %v381_v2  ;;  %v937_v59 = vsel %vm929_vm0, %v920_v31, %v921_v14  ;;  %v1523_v49 = vmul.f32 %v2868_v29, %v3449_v16 }
  0xb5   : > { %v1690_v1 = vadd.f32 %v1658_v4, %v1622_v45  ;;  %v1592_v32 = vmul.f32 %v2871_v35, %v1246_v7  ;;  %v1117_v27 = vsel %vm1110_vm5, %v1102_v26, %v1103_v18  ;;  %v382_v33 = vadd.s32 232, %v2677_v11 }
  0xb6   : > { %v922_v21 = vrot.slane %v3520_v6, 7  ;;  %vm849_vm1 = vcmp.gt.s32.totalorder %v589_v25, 0  ;;  %v1323_v48 = vmul.f32 %v2838_v9, %v3494_v62  ;;  %v1555_v61 = vadd.f32 %v1523_v49, %v1487_v0 }
  0xb7   : > { %v1758_v41 = vadd.f32 %v1726_v5, %v1690_v1  ;;  %v3546_v47 = vadd.f32 %v1390_v10, %v1354_v39  ;;  %v1066_v16 = vsel %vm849_vm1, %v937_v59, 0.0  ;;  %v1727_v60 = vmul.f32 %v2912_v19, %v3494_v62  ;;  %v3569_v5 = vld [vmem:[%s2711_s12 + $0xe8] sm:$0xff] }
  0xb8   : > { %v596_v30 = vand.u32 15, %v382_v33  ;;  %v1287_v26 = vmul.f32 %v2835_v8, %v1066_v16  ;;  %v1391_v56 = vmul.f32 %v2857_v22, %v1117_v27  ;;  %v1623_v28 = vadd.f32 %v1591_v37, %v1555_v61 }
  0xb9   : > { %v1826_v31 = vadd.f32 %v1794_v38, %v1758_v41  ;;  %v1659_v52 = vmul.f32 %v2885_v3, %v1066_v16  ;;  %v936_v36 = vsel %vm929_vm0, %v921_v14, %v922_v21  ;;  %v1104_v44 = vrot.slane %v3544_v58, 1 }
  0xba   : > { %vm886_vm2 = vcmp.lt.s32.totalorder %v596_v30, 15  ;;  %v1355_v57 = vadd.f32 %v1323_v48, %v1287_v26  ;;  %v1795_v42 = vmul.f32 %v3402_v24, %v1117_v27  ;;  %v1288_v17 = vmul.f32 %v2835_v8, %v936_v36 }
  0xbb   : > { %2491 = vmatmul.mubr.f32.gmra.mrb[6].mxu1 %v1826_v31  ;;  %v1324_v15 = vmul.f32 %v2838_v9, %v3520_v6  ;;  %v1691_v7 = vadd.f32 %v1659_v52, %v1623_v28  ;;  %v1116_v54 = vsel %vm1110_vm5, %v1103_v18, %v1104_v44  ;;  %v1488_v63 = vadd.f32 %v1456_v51, %v3496_v13 }
  0xbc   : > { %v1524_v37 = vmul.f32 %v2868_v29, %v3469_v20  ;;  %v1457_v55 = vmul.f32 %v2860_v23, %v1066_v16  ;;  %v1593_v46 = vmul.f32 %v2871_v35, %v1117_v27  ;;  %v1248_v10 = vsel %vm886_vm2, %v1116_v54, 0.0 }
  0xbd   : > { %v1458_v4 = vmul.f32 %v2860_v23, %v936_v36  ;;  %v3571_v12 = vadd.f32 %v1391_v56, %v1355_v57  ;;  %v1759_v45 = vadd.f32 %v1727_v60, %v1691_v7  ;;  %v1660_v14 = vmul.f32 %v2885_v3, %v936_v36 }
  0xbe   : > { %v1556_v2 = vadd.f32 %v1524_v37, %v1488_v63  ;;  %v1356_v39 = vadd.f32 %v1324_v15, %v1288_v17  ;;  %v1392_v13 = vmul.f32 %v2857_v22, %v1248_v10  ;;  %v383_v20 = vadd.s32 240, %v2677_v11 }
  0xbf   : > { %v923_v51 = vrot.slane %v3544_v58, 7  ;;  %v1827_v38 = vadd.f32 %v1795_v42, %v1759_v45  ;;  %v1728_v0 = vmul.f32 %v2912_v19, %v3520_v6  ;;  %v1105_v1 = vrot.slane %v3569_v5, 1 }
  0xc0   : > { %v1624_v18 = vadd.f32 %v1592_v32, %v1556_v2  ;;  %v1594_v25 = vmul.f32 %v2871_v35, %v1248_v10  ;;  %v603_v59 = vand.u32 15, %v383_v20  ;;  %v1489_v27 = vadd.f32 %v1457_v55, %v3516_v43  ;;  %v3595_v43 = vld [vmem:[%s2711_s12 + $0xf0] sm:$0xff] }
  0xc1   : > { %v935_v49 = vsel %vm929_vm0, %v922_v21, %v923_v51  ;;  %2493 = vmatprep.mubr.f32.mxu1 %v1827_v38  ;;  %v1796_v41 = vmul.f32 %v3402_v24, %v1248_v10  ;;  %v1115_v32 = vsel %vm1110_vm5, %v1104_v44, %v1105_v1  ;;  %v1525_v48 = vmul.f32 %v2868_v29, %v3494_v62 }
  0xc2   : > { %v1692_v33 = vadd.f32 %v1660_v14, %v1624_v18  ;;  %vm851_vm3 = vcmp.gt.s32.totalorder %v603_v59, 0  ;;  %v1325_v61 = vmul.f32 %v2838_v9, %v3544_v58  ;;  %v1393_v16 = vmul.f32 %v2857_v22, %v1115_v32 }
  0xc3   : > { %v1729_v21 = vmul.f32 %v2912_v19, %v3544_v58  ;;  %v1068_v30 = vsel %vm851_vm3, %v935_v49, 0.0  ;;  %v1557_v31 = vadd.f32 %v1525_v48, %v1489_v27  ;;  %v384_v26 = vadd.s32 248, %v2677_v11 }
  0xc4   : > { %v1760_v60 = vadd.f32 %v1728_v0, %v1692_v33  ;;  %v1289_v56 = vmul.f32 %v2835_v8, %v1068_v30  ;;  %v1661_v62 = vmul.f32 %v2885_v3, %v1068_v30  ;;  %v1797_v28 = vmul.f32 %v3402_v24, %v1115_v32 }
  0xc5   : > { %v924_v52 = vrot.slane %v3569_v5, 7  ;;  %v1625_v44 = vadd.f32 %v1593_v46, %v1557_v31  ;;  %v610_v57 = vand.u32 15, %v384_v26  ;;  %v1106_v42 = vrot.slane %v3595_v43, 1 }
  0xc6   : > { %v1828_v36 = vadd.f32 %v1796_v41, %v1760_v60  ;;  %v1357_v17 = vadd.f32 %v1325_v61, %v1289_v56  ;;  %v1326_v7 = vmul.f32 %v2838_v9, %v3569_v5  ;;  %v1490_v54 = vadd.f32 %v1458_v4, %v3546_v47 }
  0xc7   : > { %v934_v15 = vsel %vm929_vm0, %v923_v51, %v924_v52  ;;  %v1693_v63 = vadd.f32 %v1661_v62, %v1625_v44  ;;  %vm888_vm4 = vcmp.lt.s32.totalorder %v610_v57, 15  ;;  %v1114_v37 = vsel %vm1110_vm5, %v1105_v1, %v1106_v42 }
  0xc8   : > { %2494 = vmatmul.mubr.f32.gmra.mrb[8].mxu1 %v1828_v36  ;;  %v1290_v55 = vmul.f32 %v2835_v8, %v934_v15  ;;  %v1424_v46 = vadd.f32 %v1392_v13, %v1356_v39  ;;  %v1459_v10 = vmul.f32 %v2860_v23, %v1068_v30  ;;  %v1250_v45 = vsel %vm888_vm4, %v1114_v37, 0.0  ;;  %v3621_v13 = vld [vmem:[%s2711_s12 + $0xf8] sm:$0xff] }
  0xc9   : > { %v1526_v2 = vmul.f32 %v2868_v29, %v3520_v6  ;;  %v1425_v14 = vadd.f32 %v1393_v16, %v1357_v17  ;;  %v1595_v9 = vmul.f32 %v2871_v35, %v1115_v32  ;;  %v1761_v47 = vadd.f32 %v1729_v21, %v1693_v63  ;;  %v348_v16 = vld [vmem:[%s2716_s15 + $0x10] sm:$0xff] }
  0xca   : > { %v1460_v4 = vmul.f32 %v2860_v23, %v934_v15  ;;  %v1358_v20 = vadd.f32 %v1326_v7, %v1290_v55  ;;  %v1394_v51 = vmul.f32 %v2857_v22, %v1250_v45  ;;  %v1662_v18 = vmul.f32 %v2885_v3, %v934_v15 }
  0xcb   : > { %v1558_v38 = vadd.f32 %v1526_v2, %v1490_v54  ;;  %v1829_v8 = vadd.f32 %v1797_v28, %v1761_v47  ;;  %v1730_v39 = vmul.f32 %v2912_v19, %v3569_v5  ;;  %v385_v6 = vadd.s32 256, %v2677_v11  ;;  %v2578_v2 = vld [vmem:[%s2716_s15 + $0x18] sm:$0xff] }
  0xcc   : > { %v925_v0 = vrot.slane %v3595_v43, 7  ;;  %v1107_v59 = vrot.slane %v3621_v13, 1  ;;  %v1491_v49 = vadd.f32 %v1459_v10, %v3571_v12  ;;  %v1527_v22 = vmul.f32 %v2868_v29, %v3544_v58 }
  0xcd   : > { %v1626_v1 = vadd.f32 %v1594_v25, %v1558_v38  ;;  %2496 = vmatprep.mubr.f32.mxu1 %v1829_v8  ;;  %v1596_v27 = vmul.f32 %v2871_v35, %v1250_v45  ;;  %v617_v33 = vand.u32 15, %v385_v6  ;;  %v386_v32 = vadd.s32 264, %v2677_v11 }
  0xce   : > { %v933_v41 = vsel %vm929_vm0, %v924_v52, %v925_v0  ;;  %v1798_v61 = vmul.f32 %v3402_v24, %v1250_v45  ;;  %v1559_v25 = vadd.f32 %v1527_v22, %v1491_v49  ;;  %v926_v21 = vrot.slane %v3621_v13, 7 }
  0xcf   : > { %v1694_v48 = vadd.f32 %v1662_v18, %v1626_v1  ;;  %v1426_v12 = vadd.f32 %v1394_v51, %v1358_v20  ;;  %vm853_vm6 = vcmp.gt.s32.totalorder %v617_v33, 0  ;;  %v1731_v58 = vmul.f32 %v2912_v19, %v3595_v43 }
  0xd0   : > { %v624_v60 = vand.u32 15, %v386_v32  ;;  %v1070_v31 = vsel %vm853_vm6, %v933_v41, 0.0  ;;  %v1113_v26 = vsel %vm1110_vm5, %v1106_v42, %v1107_v59  ;;  %v1627_v56 = vadd.f32 %v1595_v9, %v1559_v25 }
  0xd1   : > { %v1762_v30 = vadd.f32 %v1730_v39, %v1694_v48  ;;  %v1663_v62 = vmul.f32 %v2885_v3, %v1070_v31  ;;  %v932_v28 = vsel %vm929_vm0, %v925_v0, %v926_v21  ;;  %v1108_v52 = vrot.slane %v348_v16, 1 }
  0xd2   : > { %vm890_vm7 = vcmp.lt.s32.totalorder %v624_v60, 15  ;;  %v1461_v44 = vmul.f32 %v2860_v23, %v1070_v31  ;;  %v1492_v57 = vadd.f32 %v1460_v4, %v1424_v46  ;;  %v1528_v17 = vmul.f32 %v2868_v29, %v3569_v5 }
  0xd3   : > { %v1830_v36 = vadd.f32 %v1798_v61, %v1762_v30  ;;  %v1695_v15 = vadd.f32 %v1663_v62, %v1627_v56  ;;  %v1799_v7 = vmul.f32 %v3402_v24, %v1113_v26  ;;  %v1112_v42 = vsel %vm1110_vm5, %v1107_v59, %v1108_v52 }
  0xd4   : > { %v1664_v54 = vmul.f32 %v2885_v3, %v932_v28  ;;  %v1252_v63 = vsel %vm890_vm7, %v1112_v42, 0.0  ;;  %v1560_v37 = vadd.f32 %v1528_v17, %v1492_v57  ;;  %v387_v55 = vadd.s32 272, %v2677_v11 }
  0xd5   : > { %2497 = vmatmul.mubr.f32.gmra.mrb[10].mxu1 %v1830_v36  ;;  %v927_v10 = vrot.slane %v348_v16, 7  ;;  %v1763_v45 = vadd.f32 %v1731_v58, %v1695_v15  ;;  %v1462_v46 = vmul.f32 %v2860_v23, %v932_v28  ;;  %v1732_v5 = vmul.f32 %v2912_v19, %v3621_v13 }
  0xd6   : > { %v1109_v9 = vrot.slane %v2578_v2, 1  ;;  %v1628_v47 = vadd.f32 %v1596_v27, %v1560_v37  ;;  %v631_v4 = vand.u32 15, %v387_v55  ;;  %v1493_v51 = vadd.f32 %v1461_v44, %v1425_v14 }
  0xd7   : > { %v931_v20 = vsel %vm929_vm0, %v926_v21, %v927_v10  ;;  %v1597_v38 = vmul.f32 %v2871_v35, %v1113_v26  ;;  %v1831_v18 = vadd.f32 %v1799_v7, %v1763_v45  ;;  %v1598_v8 = vmul.f32 %v2871_v35, %v1252_v63 }
  0xd8   : > { %v1529_v39 = vmul.f32 %v2868_v29, %v3595_v43  ;;  %v1696_v23 = vadd.f32 %v1664_v54, %v1628_v47  ;;  %v1800_v6 = vmul.f32 %v3402_v24, %v1252_v63  ;;  %vm855_vm8 = vcmp.gt.s32.totalorder %v631_v4, 0 }
  0xd9   : > { %v388_v0 = vadd.s32 280, %v2677_v11  ;;  %2499 = vmatprep.mubr.f32.mxu1 %v1831_v18  ;;  %v1072_v1 = vsel %vm855_vm8, %v931_v20, 0.0  ;;  %v1111_v59 = vsel %vm1110_vm5, %v1108_v52, %v1109_v9  ;;  %v930_v35 = vsel %vm929_vm0, %v927_v10, %v928_v50 }
  0xda   : > { %v1561_v14 = vadd.f32 %v1529_v39, %v1493_v51  ;;  %v1764_v49 = vadd.f32 %v1732_v5, %v1696_v23  ;;  %v1665_v43 = vmul.f32 %v2885_v3, %v1072_v1  ;;  %v1494_v27 = vadd.f32 %v1462_v46, %v1426_v12 }
  0xdb   : > { %v638_v22 = vand.u32 15, %v388_v0  ;;  %v1733_v41 = vmul.f32 %v2912_v19, %v348_v16  ;;  %v1146_v32 = vsel %vm1110_vm5, %v1109_v9, %v1074_v53  ;;  %v1530_v48 = vmul.f32 %v2868_v29, %v3621_v13 }
  0xdc   : > { %v1629_v33 = vadd.f32 %v1597_v38, %v1561_v14  ;;  %v1832_v40 = vadd.f32 %v1800_v6, %v1764_v49  ;;  %v1801_v50 = vmul.f32 %v3402_v24, %v1111_v59  ;;  %v1666_v21 = vmul.f32 %v2885_v3, %v930_v35 }
  0xdd   : > { %vm892_vm9 = vcmp.lt.s32.totalorder %v638_v22, 15  ;;  %v1562_v25 = vadd.f32 %v1530_v48, %v1494_v27  ;;  %v1734_v34 = vmul.f32 %v2578_v2, %v2912_v19  ;;  %vm2182_vm0 = vcmask 1040384  }
  0xde   : > { %v1697_v61 = vadd.f32 %v1665_v43, %v1629_v33  ;;  %2500 = vmatmul.mubr.f32.gmra.mrb[12].mxu1 %v1832_v40  ;;  %v1254_v12 = vsel %vm892_vm9, %v1146_v32, 0.0 }
  0xdf   : > { %v1630_v58 = vadd.f32 %v1598_v8, %v1562_v25  ;;  %v1802_v60 = vmul.f32 %v3402_v24, %v1254_v12 }
  0xe0   : > { %v1765_v16 = vadd.f32 %v1733_v41, %v1697_v61 }
  0xe1   : > { %v1698_v53 = vadd.f32 %v1666_v21, %v1630_v58 }
  0xe2   : > { %v1833_v11 = vadd.f32 %v1801_v50, %v1765_v16 }
  0xe3   : > { %v1766_v29 = vadd.f32 %v1734_v34, %v1698_v53 }
  0xe4   : > { %2502 = vmatprep.mubr.f32.mxu1 %v1833_v11 }
  0xe5   : > { %v1834_v13 = vadd.f32 %v1802_v60, %v1766_v29 }
  0xe7   : > { %2503 = vmatmul.mubr.f32.gmra.mrb[14].mxu1 %v1834_v13 }
 0x10b   : > { %v2459_v3 = vpop.f32.mrb[0].mxu0 }
 0x10c   : > { %v2114_v19 = vmul.f32 %v2459_v3, %v2459_v3  ;;  %2186 = vst [vmem:[%s3686_s28 + $0x8] sm:$0xff] %v2459_v3  ;;  %v1917_v30 = vpop.f32.mrb[1].mxu0 }
 0x10d   : > { %v2076_v24 = vadd.f32 %v2459_v3, %v1917_v30  ;;  %v2113_v31 = vmul.f32 %v1917_v30, %v1917_v30  ;;  %2185 = vst [vmem:[%s3686_s28] sm:$0xff] %v1917_v30 }
 0x10f   : > { %v2145_v26 = vadd.f32 %v2114_v19, %v2113_v31 }
 0x115   : > { %v2462_v56 = vpop.f32.mrb[2].mxu0 }
 0x116   : > { %2188 = vst [vmem:[%s3686_s28 + $0x18] sm:$0xff] %v2462_v56  ;;  %v1927_v62 = vpop.f32.mrb[3].mxu0  ;;  %v2116_v36 = vmul.f32 %v2462_v56, %v2462_v56 }
 0x117   : > { %v2077_v28 = vadd.f32 %v2076_v24, %v1927_v62  ;;  %v2115_v52 = vmul.f32 %v1927_v62, %v1927_v62  ;;  %2187 = vst [vmem:[%s3686_s28 + $0x10] sm:$0xff] %v1927_v62 }
 0x119   : > { %v2146_v44 = vadd.f32 %v2145_v26, %v2115_v52  ;;  %v2078_v57 = vadd.f32 %v2462_v56, %v2077_v28 }
 0x11b   : > { %v2147_v17 = vadd.f32 %v2146_v44, %v2116_v36 }
 0x11d   : > { %v2465_v15 = vpop.f32.mrb[4].mxu0 }
 0x11e   : > { %2190 = vst [vmem:[%s3686_s28 + $0x28] sm:$0xff] %v2465_v15  ;;  %v1937_v7 = vpop.f32.mrb[5].mxu0  ;;  %v2118_v63 = vmul.f32 %v2465_v15, %v2465_v15 }
 0x11f   : > { %v2079_v42 = vadd.f32 %v2078_v57, %v1937_v7  ;;  %v2117_v54 = vmul.f32 %v1937_v7, %v1937_v7  ;;  %2189 = vst [vmem:[%s3686_s28 + $0x20] sm:$0xff] %v1937_v7 }
 0x121   : > { %v2148_v37 = vadd.f32 %v2147_v17, %v2117_v54  ;;  %v2080_v55 = vadd.f32 %v2465_v15, %v2079_v42 }
 0x123   : > { %v2149_v10 = vadd.f32 %v2148_v37, %v2118_v63 }
 0x12b   : > { %v2468_v45 = vpop.f32.mrb[6].mxu0 }
 0x12c   : > { %2192 = vst [vmem:[%s3686_s28 + $0x38] sm:$0xff] %v2468_v45  ;;  %v1947_v46 = vpop.f32.mrb[7].mxu0  ;;  %v2120_v9 = vmul.f32 %v2468_v45, %v2468_v45 }
 0x12d   : > { %v2081_v5 = vadd.f32 %v2080_v55, %v1947_v46  ;;  %v2119_v2 = vmul.f32 %v1947_v46, %v1947_v46  ;;  %2191 = vst [vmem:[%s3686_s28 + $0x30] sm:$0xff] %v1947_v46 }
 0x12f   : > { %v2150_v47 = vadd.f32 %v2149_v10, %v2119_v2  ;;  %v2082_v4 = vadd.f32 %v2468_v45, %v2081_v5 }
 0x131   : > { %v2151_v20 = vadd.f32 %v2150_v47, %v2120_v9 }
 0x137   : > { %v2471_v51 = vpop.f32.mrb[8].mxu0 }
 0x138   : > { %2194 = vst [vmem:[%s3686_s28 + $0x48] sm:$0xff] %v2471_v51  ;;  %v1957_v38 = vpop.f32.mrb[9].mxu0  ;;  %v2122_v39 = vmul.f32 %v2471_v51, %v2471_v51 }
 0x139   : > { %v2083_v18 = vadd.f32 %v2082_v4, %v1957_v38  ;;  %v2121_v8 = vmul.f32 %v1957_v38, %v1957_v38  ;;  %2193 = vst [vmem:[%s3686_s28 + $0x40] sm:$0xff] %v1957_v38 }
 0x13b   : > { %v2152_v23 = vadd.f32 %v2151_v20, %v2121_v8  ;;  %v2084_v6 = vadd.f32 %v2471_v51, %v2083_v18 }
 0x13d   : > { %v2153_v0 = vadd.f32 %v2152_v23, %v2122_v39 }
 0x143   : > { %v2474_v1 = vpop.f32.mrb[10].mxu0 }
 0x144   : > { %2196 = vst [vmem:[%s3686_s28 + $0x58] sm:$0xff] %v2474_v1  ;;  %v1967_v59 = vpop.f32.mrb[11].mxu0  ;;  %v2124_v49 = vmul.f32 %v2474_v1, %v2474_v1 }
 0x145   : > { %v2085_v14 = vadd.f32 %v2084_v6, %v1967_v59  ;;  %v2123_v35 = vmul.f32 %v1967_v59, %v1967_v59  ;;  %2195 = vst [vmem:[%s3686_s28 + $0x50] sm:$0xff] %v1967_v59 }
 0x147   : > { %v2154_v43 = vadd.f32 %v2153_v0, %v2123_v35  ;;  %v2086_v22 = vadd.f32 %v2474_v1, %v2085_v14 }
 0x149   : > { %v2155_v27 = vadd.f32 %v2154_v43, %v2124_v49 }
 0x150   : > { %v2477_v33 = vpop.f32.mrb[12].mxu0 }
 0x151   : > { %2198 = vst [vmem:[%s3686_s28 + $0x68] sm:$0xff] %v2477_v33  ;;  %v1977_v41 = vpop.f32.mrb[13].mxu0  ;;  %v2126_v40 = vmul.f32 %v2477_v33, %v2477_v33 }
 0x152   : > { %v2087_v32 = vadd.f32 %v2086_v22, %v1977_v41  ;;  %v2125_v48 = vmul.f32 %v1977_v41, %v1977_v41  ;;  %2197 = vst [vmem:[%s3686_s28 + $0x60] sm:$0xff] %v1977_v41 }
 0x154   : > { %v2156_v61 = vadd.f32 %v2155_v27, %v2125_v48  ;;  %v2088_v50 = vadd.f32 %v2477_v33, %v2087_v32 }
 0x156   : > { %v2157_v25 = vadd.f32 %v2156_v61, %v2126_v40 }
 0x15c   : > { %v2480_v21 = vpop.f32.mrb[14].mxu0 }
 0x15d   : > { %2200 = vst [vmem:[%s3686_s28 + $0x78] sm:$0xff] %v2480_v21  ;;  %v1987_v12 = vpop.f32.mrb[15].mxu0  ;;  %v2128_v34 = vmul.f32 %v2480_v21, %v2480_v21 }
 0x15e   : > { %v2089_v16 = vadd.f32 %v2088_v50, %v1987_v12  ;;  %v2127_v58 = vmul.f32 %v1987_v12, %v1987_v12  ;;  %2199 = vst [vmem:[%s3686_s28 + $0x70] sm:$0xff] %v1987_v12 }
 0x160   : > { %v2090_v11 = vadd.f32 %v2480_v21, %v2089_v16  ;;  %v2158_v53 = vadd.f32 %v2157_v25, %v2127_v58 }
 0x162   : > { %v2159_v60 = vadd.f32 %v2158_v53, %v2128_v34 }
 0x16b   : > { %v2483_v29 = vpop.f32.mrb[0].mxu1 }
 0x16c   : > { %2202 = vst [vmem:[%s3686_s28 + $0x88] sm:$0xff] %v2483_v29  ;;  %v1997_v13 = vpop.f32.mrb[1].mxu1  ;;  %v2130_v30 = vmul.f32 %v2483_v29, %v2483_v29 }
 0x16d   : > { %v2091_v3 = vadd.f32 %v2090_v11, %v1997_v13  ;;  %v2129_v19 = vmul.f32 %v1997_v13, %v1997_v13  ;;  %2201 = vst [vmem:[%s3686_s28 + $0x80] sm:$0xff] %v1997_v13 }
 0x16f   : > { %v2160_v24 = vadd.f32 %v2159_v60, %v2129_v19  ;;  %v2092_v31 = vadd.f32 %v2483_v29, %v2091_v3 }
 0x171   : > { %v2161_v26 = vadd.f32 %v2160_v24, %v2130_v30 }
 0x176   : > { %v2486_v56 = vpop.f32.mrb[2].mxu1 }
 0x177   : > { %2204 = vst [vmem:[%s3686_s28 + $0x98] sm:$0xff] %v2486_v56  ;;  %v2007_v62 = vpop.f32.mrb[3].mxu1  ;;  %v2132_v36 = vmul.f32 %v2486_v56, %v2486_v56 }
 0x178   : > { %v2093_v28 = vadd.f32 %v2092_v31, %v2007_v62  ;;  %v2131_v52 = vmul.f32 %v2007_v62, %v2007_v62  ;;  %2203 = vst [vmem:[%s3686_s28 + $0x90] sm:$0xff] %v2007_v62 }
 0x17a   : > { %v2162_v44 = vadd.f32 %v2161_v26, %v2131_v52  ;;  %v2094_v57 = vadd.f32 %v2486_v56, %v2093_v28 }
 0x17c   : > { %v2163_v17 = vadd.f32 %v2162_v44, %v2132_v36 }
 0x183   : > { %v2489_v15 = vpop.f32.mrb[4].mxu1 }
 0x184   : > { %2206 = vst [vmem:[%s3686_s28 + $0xa8] sm:$0xff] %v2489_v15  ;;  %v2017_v7 = vpop.f32.mrb[5].mxu1  ;;  %v2134_v63 = vmul.f32 %v2489_v15, %v2489_v15 }
 0x185   : > { %v2095_v42 = vadd.f32 %v2094_v57, %v2017_v7  ;;  %v2133_v54 = vmul.f32 %v2017_v7, %v2017_v7  ;;  %2205 = vst [vmem:[%s3686_s28 + $0xa0] sm:$0xff] %v2017_v7 }
 0x187   : > { %v2164_v37 = vadd.f32 %v2163_v17, %v2133_v54  ;;  %v2096_v55 = vadd.f32 %v2489_v15, %v2095_v42 }
 0x189   : > { %v2165_v10 = vadd.f32 %v2164_v37, %v2134_v63 }
 0x18e   : > { %v2492_v45 = vpop.f32.mrb[6].mxu1 }
 0x18f   : > { %2208 = vst [vmem:[%s3686_s28 + $0xb8] sm:$0xff] %v2492_v45  ;;  %v2027_v46 = vpop.f32.mrb[7].mxu1  ;;  %v2136_v9 = vmul.f32 %v2492_v45, %v2492_v45 }
 0x190   : > { %v2097_v5 = vadd.f32 %v2096_v55, %v2027_v46  ;;  %v2135_v2 = vmul.f32 %v2027_v46, %v2027_v46  ;;  %2207 = vst [vmem:[%s3686_s28 + $0xb0] sm:$0xff] %v2027_v46 }
 0x192   : > { %v2166_v47 = vadd.f32 %v2165_v10, %v2135_v2  ;;  %v2098_v4 = vadd.f32 %v2492_v45, %v2097_v5 }
 0x194   : > { %v2167_v20 = vadd.f32 %v2166_v47, %v2136_v9 }
 0x19b   : > { %v2495_v51 = vpop.f32.mrb[8].mxu1 }
 0x19c   : > { %2210 = vst [vmem:[%s3686_s28 + $0xc8] sm:$0xff] %v2495_v51  ;;  %v2037_v38 = vpop.f32.mrb[9].mxu1  ;;  %v2138_v39 = vmul.f32 %v2495_v51, %v2495_v51 }
 0x19d   : > { %v2099_v18 = vadd.f32 %v2098_v4, %v2037_v38  ;;  %v2137_v8 = vmul.f32 %v2037_v38, %v2037_v38  ;;  %2209 = vst [vmem:[%s3686_s28 + $0xc0] sm:$0xff] %v2037_v38 }
 0x19f   : > { %v2168_v23 = vadd.f32 %v2167_v20, %v2137_v8  ;;  %v2100_v6 = vadd.f32 %v2495_v51, %v2099_v18 }
 0x1a1   : > { %v2169_v0 = vadd.f32 %v2168_v23, %v2138_v39 }
 0x1a8   : > { %v2498_v1 = vpop.f32.mrb[10].mxu1 }
 0x1a9   : > { %2212 = vst [vmem:[%s3686_s28 + $0xd8] sm:$0xff] %v2498_v1  ;;  %v2047_v59 = vpop.f32.mrb[11].mxu1  ;;  %v2140_v49 = vmul.f32 %v2498_v1, %v2498_v1 }
 0x1aa   : > { %v2101_v14 = vadd.f32 %v2100_v6, %v2047_v59  ;;  %v2139_v35 = vmul.f32 %v2047_v59, %v2047_v59  ;;  %2211 = vst [vmem:[%s3686_s28 + $0xd0] sm:$0xff] %v2047_v59 }
 0x1ac   : > { %v2170_v43 = vadd.f32 %v2169_v0, %v2139_v35  ;;  %v2102_v22 = vadd.f32 %v2498_v1, %v2101_v14 }
 0x1ae   : > { %v2171_v27 = vadd.f32 %v2170_v43, %v2140_v49 }
 0x1b1   : > { %v2501_v33 = vpop.f32.mrb[12].mxu1 }
 0x1b2   : > { %2214 = vst [vmem:[%s3686_s28 + $0xe8] sm:$0xff] %v2501_v33  ;;  %v2057_v41 = vpop.f32.mrb[13].mxu1  ;;  %v2142_v40 = vmul.f32 %v2501_v33, %v2501_v33 }
 0x1b3   : > { %v2103_v32 = vadd.f32 %v2102_v22, %v2057_v41  ;;  %v2141_v48 = vmul.f32 %v2057_v41, %v2057_v41  ;;  %2213 = vst [vmem:[%s3686_s28 + $0xe0] sm:$0xff] %v2057_v41 }
 0x1b5   : > { %v2172_v61 = vadd.f32 %v2171_v27, %v2141_v48  ;;  %v2104_v50 = vadd.f32 %v2501_v33, %v2103_v32 }
 0x1b7   : > { %v2173_v25 = vadd.f32 %v2172_v61, %v2142_v40 }
 0x1ba   : > { %v2504_v21 = vpop.f32.mrb[14].mxu1 }
 0x1bb   : > { %2216 = vst [vmem:[%s3686_s28 + $0xf8] sm:$0xff] %v2504_v21  ;;  %v2067_v12 = vpop.f32.mrb[15].mxu1  ;;  %v2144_v34 = vmul.f32 %v2504_v21, %v2504_v21 }
 0x1bc   : > { %v2105_v16 = vadd.f32 %v2104_v50, %v2067_v12  ;;  %v2143_v58 = vmul.f32 %v2067_v12, %v2067_v12  ;;  %2215 = vst [vmem:[%s3686_s28 + $0xf0] sm:$0xff] %v2067_v12 }
 0x1be   : > { %v2106_v11 = vadd.f32 %v2504_v21, %v2105_v16  ;;  %v2174_v53 = vadd.f32 %v2173_v25, %v2143_v58 }
 0x1c0   : > { %v2107_v60 = vrot.slane %v2106_v11, 4  ;;  %v2175_v29 = vadd.f32 %v2174_v53, %v2144_v34 }
 0x1c2   : > { %v2108_v13 = vadd.f32 %v2107_v60, %v2106_v11  ;;  %v2176_v3 = vrot.slane %v2175_v29, 4 }
 0x1c4   : > { %v2109_v19 = vrot.slane %v2108_v13, 2  ;;  %v2177_v30 = vadd.f32 %v2176_v3, %v2175_v29 }
 0x1c6   : > { %v2110_v24 = vadd.f32 %v2109_v19, %v2108_v13  ;;  %v2178_v31 = vrot.slane %v2177_v30, 2 }
 0x1c8   : > { %v2111_v26 = vrot.slane %v2110_v24, 1  ;;  %v2179_v56 = vadd.f32 %v2178_v31, %v2177_v30 }
 0x1ca   : > { %v2180_v62 = vrot.slane %v2179_v56, 1  ;;  %v2112_v28 = vadd.f32 %v2111_v26, %v2110_v24 }
 0x1cc   : > { %v2181_v52 = vadd.f32 %v2180_v62, %v2179_v56 }
 0x1ce   : > { %v2183_v36 = vsel %vm2182_vm0, %v2112_v28, %v2181_v52 }
 0x1cf   : > { %2184 = vst [vmem:[%s312_s7] sm:$0x3] %v2183_v36 }
 0x1d0 PF: > { %s16_s20 = sadd.s32 1, %s2601_s20   ;;  %s3749_s18 = smov %s2597_s19 }
 0x1d1   : > { %p13_p5 = scmp.ge.s32.totalorder %s16_s20, 4   ;;  %s3750_s19 = smov %s3752_s21 }
 0x1d3   :  { %15 = sbr.rel (!%p13_p5) target bundleno = 2 (0x2), region = 81 }

</bundles_post_ra>
